<compile_context>
chip_gen: v7x
topology: tpu7x:2x2x1
jax: 0.10.0
libtpu: 0.0.40
codegen_flags: <defaults>
</compile_context>

<pallas_src>
import functools

import jax
import jax.numpy as jnp
import numpy as np
from jax.experimental import pallas as pl
from jax.experimental.pallas import tpu as pltpu

BN_EPS = 1e-5    # torch.nn.BatchNorm3d default
LANES = 128


# ----------------------------------------------------------------------------
# Pass 1: conv1 (5x5x5, pad=2) + bias for one depth slab, plus BN partial
# statistics.  Grid = (N * num_slabs,).  Per output plane d, 25 MXU matmuls
# (one per (kd, kh) tap) of a sublane-offset slice of the slab against a
# banded weight give the lane-dense (H, W*C) plane directly.
# ----------------------------------------------------------------------------
def _conv1_stats_kernel(x_ref, w_ref, b_ref, y_ref, st_ref, *, Dt, H):
    # x_ref : ((Dt+4)*(H+4), (W+4)*Cin)  padded slab, (depth,h) rows, (w,ci) lanes
    # w_ref : (25, (W+4)*Cin, W*C)       banded conv1 weights, one per (kd,kh)
    # b_ref : (1, W*C)                   conv1 bias tiled over w
    # y_ref : (Dt*H, W*C)                conv1 + bias output (lane-dense)
    # st_ref: (2, W*C)                   per-slab [sum, sum_sq] partials
    Hp = H + 4
    NCl = y_ref.shape[-1]
    st_ref[...] = jnp.zeros(st_ref.shape, st_ref.dtype)

    @pl.loop(0, Dt)
    def _plane(d):
        acc = jnp.zeros((H, NCl), jnp.float32)
        for kd in range(5):
            for kh in range(5):
                row0 = (d + kd) * Hp + kh
                acc = acc + jnp.dot(x_ref[pl.ds(row0, H), :],
                                    w_ref[kd * 5 + kh],
                                    preferred_element_type=jnp.float32)
        y = acc + b_ref[...]                              # (H, W*C)
        row_out = d * H
        if H % 8 == 0:
            row_out = pl.multiple_of(row_out, 8)          # aligned stores
        y_ref[pl.ds(row_out, H), :] = y
        s = jnp.sum(y, axis=0, keepdims=True)             # (1, W*C)
        ss = jnp.sum(y * y, axis=0, keepdims=True)        # (1, W*C)
        st_ref[...] += jnp.concatenate([s, ss], axis=0)


# ----------------------------------------------------------------------------
# Pass 2: BatchNorm (folded scale/shift) + ELU + 1x1x1 conv, fully lane-dense.
# Rows pack G = 128//C spatial positions; conv2 is a dense 128x128 MXU matmul
# against a block-diagonal replication of the CxC weight.
# ----------------------------------------------------------------------------
def _bn_elu_conv2_kernel(y_ref, sc_ref, sh_ref, w2_ref, b2_ref, o_ref):
    y = y_ref[...] * sc_ref[...] + sh_ref[...]            # fused BN
    y = jnp.where(y > 0, y, jnp.expm1(y))                 # ELU (alpha = 1)
    o_ref[...] = jnp.dot(y, w2_ref[...],
                         preferred_element_type=jnp.float32) + b2_ref[...]


def _pick_slab_depth(D, H, W, Cin, C, budget_bytes=12 * 1024 * 1024):
    """Largest divisor Dt of D whose per-step pass-1 VMEM estimate fits."""
    for dt in range(D, 0, -1):
        if D % dt:
            continue
        est = 4 * (2 * (dt + 4) * (H + 4) * (W + 4) * Cin   # input slab (x2 buf)
                   + 2 * dt * H * W * C                     # staged y block (x2 buf)
                   + 25 * (W + 4) * Cin * W * C             # banded conv1 weights
                   + 8 * W * C)                             # bias + stats
        if est <= budget_bytes:
            return dt
    return 1


def output_transition_forward(x_ncdhw, w1, b1, gamma, beta, w2, b2,
                              *, slab_depth=None):
    """x: (N, Cin, D, H, W); w1: (C, Cin, 5,5,5); w2: (C, C, 1,1,1) -> NCDHW."""
    f32 = jnp.float32
    N, Cin, D, H, W = x_ncdhw.shape
    C = w1.shape[0]
    assert LANES % C == 0, "classes must divide 128 for lane-dense packing"
    assert (N * D * H * W * C) % LANES == 0, "total elems must be a multiple of 128"

    Dt = slab_depth if slab_depth is not None else _pick_slab_depth(D, H, W, Cin, C)
    assert D % Dt == 0, "slab depth must divide D"
    S = D // Dt
    NS = N * S
    W4, H4 = W + 4, H + 4
    L = W4 * Cin           # input lane width: (w', ci) folded
    NCl = W * C            # output lane width: (w, c) folded
    RS = (Dt + 4) * H4     # input rows per slab: (depth, h) folded

    # ---- glue: NCDHW -> padded NDHWC, depth-slab (halo) view, lane folding ----
    x = jnp.transpose(x_ncdhw, (0, 2, 3, 4, 1)).astype(f32)
    xp = jnp.pad(x, ((0, 0), (2, 2), (2, 2), (2, 2), (0, 0)))    # (N,D+4,H+4,W+4,Cin)
    if S == 1:
        xs = xp.reshape(NS, RS, L)                               # no halo duplication
    else:
        didx = jnp.arange(S)[:, None] * Dt + jnp.arange(Dt + 4)[None, :]
        xs = xp[:, didx].reshape(NS, RS, L)                      # small (Dt+4)/Dt halo

    # ---- conv1 weights as 25 banded lane-conv matrices (kd,kh) ----
    # w1b[kd*5+kh, p*Cin+ci, w*C+c] = w1[c, ci, kd, kh, p-w]  for p-w in [0,5)
    sel = (jnp.arange(W4)[:, None, None] ==
           (jnp.arange(W)[None, :, None] + jnp.arange(5)[None, None, :])).astype(f32)
    w1b = jnp.einsum('pwk,cidhk->dhpiwc', sel, w1.astype(f32)).reshape(25, L, NCl)
    b1_l = jnp.tile(b1.astype(f32), W).reshape(1, NCl)

    kernel1 = functools.partial(_conv1_stats_kernel, Dt=Dt, H=H)
    y_sl, stats = pl.pallas_call(
        kernel1,
        grid=(NS,),
        in_specs=[
            pl.BlockSpec((None, RS, L), lambda i: (i, 0, 0)),
            pl.BlockSpec((25, L, NCl), lambda i: (0, 0, 0)),
            pl.BlockSpec((1, NCl), lambda i: (0, 0)),
        ],
        out_specs=[
            pl.BlockSpec((None, Dt * H, NCl), lambda i: (i, 0, 0)),
            pl.BlockSpec((None, 2, NCl), lambda i: (i, 0, 0)),
        ],
        out_shape=[
            jax.ShapeDtypeStruct((NS, Dt * H, NCl), f32),
            jax.ShapeDtypeStruct((NS, 2, NCl), f32),
        ],
        compiler_params=pltpu.CompilerParams(
            dimension_semantics=("parallel",),
            vmem_limit_bytes=32 * 1024 * 1024),
    )(xs, w1b, b1_l)

    # ---- fold batch stats into per-channel scale/shift (Chan-style combine) ----
    Mtot = N * D * H * W
    n_slab = Dt * H * W
    sums = stats[:, 0, :].reshape(NS, W, C).sum(axis=1)          # (NS, C)
    sqs = stats[:, 1, :].reshape(NS, W, C).sum(axis=1)           # (NS, C)
    mean = sums.sum(axis=0) / Mtot                               # (C,)
    m_i = sums / n_slab                                          # per-slab means
    m2_i = sqs - n_slab * m_i * m_i                              # per-slab centered SSQ
    var = (m2_i.sum(axis=0) + n_slab * jnp.sum((m_i - mean) ** 2, axis=0)) / Mtot
    inv = jax.lax.rsqrt(var + BN_EPS)
    scale = gamma.astype(f32) * inv
    shift = beta.astype(f32) - mean * scale

    # ---- lane-dense pass 2: (Mg, 128), lane = (pos % G) * C + channel ----
    G = LANES // C
    Mg = (Mtot * C) // LANES
    y2d = y_sl.reshape(Mg, LANES)

    scale_l = jnp.tile(scale, G).reshape(1, LANES)
    shift_l = jnp.tile(shift, G).reshape(1, LANES)
    b2_l = jnp.tile(b2.astype(f32), G).reshape(1, LANES)
    w2m = jnp.transpose(w2.astype(f32).reshape(C, C))            # (cin, cout)
    w2_blk = jnp.kron(jnp.eye(G, dtype=f32), w2m)                # (128, 128) block-diag

    TM = min(1024, Mg)
    num_tiles = (Mg + TM - 1) // TM
    Mg_pad = num_tiles * TM
    if Mg_pad != Mg:
        y2d = jnp.pad(y2d, ((0, Mg_pad - Mg), (0, 0)))

    out2d = pl.pallas_call(
        _bn_elu_conv2_kernel,
        grid=(num_tiles,),
        in_specs=[
            pl.BlockSpec((TM, LANES), lambda i: (i, 0)),
            pl.BlockSpec((1, LANES), lambda i: (0, 0)),
            pl.BlockSpec((1, LANES), lambda i: (0, 0)),
            pl.BlockSpec((LANES, LANES), lambda i: (0, 0)),
            pl.BlockSpec((1, LANES), lambda i: (0, 0)),
        ],
        out_specs=pl.BlockSpec((TM, LANES), lambda i: (i, 0)),
        out_shape=jax.ShapeDtypeStruct((Mg_pad, LANES), f32),
        compiler_params=pltpu.CompilerParams(
            dimension_semantics=("parallel",),
            vmem_limit_bytes=32 * 1024 * 1024),
    )(y2d, scale_l, shift_l, w2_blk, b2_l)

    out = out2d[:Mg].reshape(N, D, H, W, C)
    return jnp.transpose(out, (0, 4, 1, 2, 3))                   # back to NCDHW


def _reference(x, w1, b1, gamma, beta, w2, b2):
    """Pure-JAX reference matching PyTorch semantics (NCDHW, training-mode BN)."""
    hi = jax.lax.Precision.HIGHEST
    y = jax.lax.conv_general_dilated(
        x, w1, (1, 1, 1), [(2, 2), (2, 2), (2, 2)],
        dimension_numbers=('NCDHW', 'OIDHW', 'NCDHW'),
        precision=hi) + b1.reshape(1, -1, 1, 1, 1)
    mean = jnp.mean(y, axis=(0, 2, 3, 4), keepdims=True)
    var = jnp.mean((y - mean) ** 2, axis=(0, 2, 3, 4), keepdims=True)
    y = (y - mean) * jax.lax.rsqrt(var + BN_EPS)
    y = y * gamma.reshape(1, -1, 1, 1, 1) + beta.reshape(1, -1, 1, 1, 1)
    y = jnp.where(y > 0, y, jnp.expm1(y))
    y = jax.lax.conv_general_dilated(
        y, w2, (1, 1, 1), [(0, 0), (0, 0), (0, 0)],
        dimension_numbers=('NCDHW', 'OIDHW', 'NCDHW'),
        precision=hi) + b2.reshape(1, -1, 1, 1, 1)
    return y


if __name__ == "__main__":
    # OutputTransition(in_channels=4, classes=4, elu=True) on (N=2, Cin=4, 8^3).
    N, Cin, C, D, H, W = 2, 4, 4, 8, 8, 8
    key = jax.random.PRNGKey(0)
    k = jax.random.split(key, 7)

    x = jax.random.normal(k[0], (N, Cin, D, H, W), jnp.float32)
    w1 = 0.1 * jax.random.normal(k[1], (C, Cin, 5, 5, 5), jnp.float32)
    b1 = 0.1 * jax.random.normal(k[2], (C,), jnp.float32)
    gamma = 1.0 + 0.1 * jax.random.normal(k[3], (C,), jnp.float32)
    beta = 0.1 * jax.random.normal(k[4], (C,), jnp.float32)
    w2 = 0.1 * jax.random.normal(k[5], (C, C, 1, 1, 1), jnp.float32)
    b2 = 0.1 * jax.random.normal(k[6], (C,), jnp.float32)

    ref = jax.block_until_ready(_reference(x, w1, b1, gamma, beta, w2, b2))

    # Default path: one full-depth slab per batch element (no halo duplication).
    out = jax.block_until_ready(
        output_transition_forward(x, w1, b1, gamma, beta, w2, b2))
    np.testing.assert_allclose(np.asarray(out), np.asarray(ref),
                               rtol=2e-4, atol=2e-4)

    # Also exercise the multi-slab halo path (2 depth slabs per batch element).
    out_slab = jax.block_until_ready(
        output_transition_forward(x, w1, b1, gamma, beta, w2, b2, slab_depth=4))
    np.testing.assert_allclose(np.asarray(out_slab), np.asarray(ref),
                               rtol=2e-4, atol=2e-4)

    print("KERNEL_OK")
</pallas_src>

<mosaic_0001>
module attributes {stable_mosaic.version = 11 : i64} {
  func.func @_conv1_stats_kernel(%arg0: i32, %arg1: memref<1x144x48xf32, #tpu.memory_space<vmem>>, %arg2: memref<25x48x32xf32, #tpu.memory_space<vmem>>, %arg3: memref<1x32xf32, #tpu.memory_space<vmem>>, %arg4: memref<1x64x32xf32, #tpu.memory_space<vmem>>, %arg5: memref<1x2x32xf32, #tpu.memory_space<vmem>>) attributes {dimension_semantics = [#tpu.dimension_semantics<parallel>], iteration_bounds = array<i64: 2>, scalar_prefetch = 0 : i64, scratch_operands = 0 : i64, tpu.core_type = #tpu.core_type<tc>, window_params = [{transform_indices = @transform_0, window_bounds = array<i64: 1, 144, 48>}, {pipeline_mode = #tpu.pipeline_mode<synchronous>, transform_indices = @transform_1, window_bounds = array<i64: 25, 48, 32>}, {pipeline_mode = #tpu.pipeline_mode<synchronous>, transform_indices = @transform_2, window_bounds = array<i64: 1, 32>}, {transform_indices = @transform_3, window_bounds = array<i64: 1, 64, 32>}, {transform_indices = @transform_4, window_bounds = array<i64: 1, 2, 32>}]} {
    %cst = arith.constant 0.000000e+00 : f32
    %0 = vector.broadcast %cst : f32 to vector<2x32xf32>
    %c0 = arith.constant 0 : index
    %c0_0 = arith.constant 0 : index
    %c0_1 = arith.constant 0 : index
    %1 = vector.load %arg5[%c0, %c0_0, %c0_1] : memref<1x2x32xf32, #tpu.memory_space<vmem>>, vector<1x2x32xf32>
    %2 = vector.shape_cast %1 : vector<1x2x32xf32> to vector<2x32xf32>
    %3 = vector.shape_cast %0 : vector<2x32xf32> to vector<1x2x32xf32>
    tpu.vector_store %arg5[%c0, %c0_0, %c0_1], %3 {strides = array<i32>} : memref<1x2x32xf32, #tpu.memory_space<vmem>>, vector<1x2x32xf32>,
    %c0_i32 = arith.constant 0 : i32
    %c8_i32 = arith.constant 8 : i32
    %4 = arith.addi %c0_i32, %c8_i32 : i32
    %c1_i32 = arith.constant 1 : i32
    scf.for %arg6 = %c0_i32 to %4 step %c1_i32  : i32 {
      %c1_i32_3 = arith.constant 1 : i32
      %5 = arith.muli %arg6, %c1_i32_3 : i32
      %c0_i32_4 = arith.constant 0 : i32
      %6 = arith.addi %c0_i32_4, %5 : i32
      %cst_5 = arith.constant 0.000000e+00 : f32
      %7 = vector.broadcast %cst_5 : f32 to vector<8x32xf32>
      %c0_i32_6 = arith.constant 0 : i32
      %8 = arith.addi %6, %c0_i32_6 : i32
      %c12_i32 = arith.constant 12 : i32
      %9 = arith.muli %8, %c12_i32 : i32
      %c0_i32_7 = arith.constant 0 : i32
      %10 = arith.addi %9, %c0_i32_7 : i32
      %c0_8 = arith.constant 0 : index
      %11 = arith.index_cast %10 : i32 to index
      %c0_9 = arith.constant 0 : index
      %12 = vector.load %arg1[%c0_8, %11, %c0_9] : memref<1x144x48xf32, #tpu.memory_space<vmem>>, vector<1x8x48xf32>
      %13 = vector.shape_cast %12 : vector<1x8x48xf32> to vector<8x48xf32>
      %c0_10 = arith.constant 0 : index
      %c0_11 = arith.constant 0 : index
      %c0_12 = arith.constant 0 : index
      %14 = vector.load %arg2[%c0_10, %c0_11, %c0_12] : memref<25x48x32xf32, #tpu.memory_space<vmem>>, vector<1x48x32xf32>
      %15 = vector.shape_cast %14 : vector<1x48x32xf32> to vector<48x32xf32>
      %cst_13 = arith.constant dense<0.000000e+00> : vector<8x32xf32>
      %16 = tpu.matmul %13, %15, %cst_13 {dimension_numbers = #tpu.dot_dimension_numbers<[1], [0], [0], [1], [0, 0, 1, 1], [], []>} : vector<8x48xf32>, vector<48x32xf32>, vector<8x32xf32> -> vector<8x32xf32>
      %17 = arith.addf %7, %16 : vector<8x32xf32>
      %c0_i32_14 = arith.constant 0 : i32
      %18 = arith.addi %6, %c0_i32_14 : i32
      %c12_i32_15 = arith.constant 12 : i32
      %19 = arith.muli %18, %c12_i32_15 : i32
      %c1_i32_16 = arith.constant 1 : i32
      %20 = arith.addi %19, %c1_i32_16 : i32
      %c0_17 = arith.constant 0 : index
      %21 = arith.index_cast %20 : i32 to index
      %c0_18 = arith.constant 0 : index
      %22 = vector.load %arg1[%c0_17, %21, %c0_18] : memref<1x144x48xf32, #tpu.memory_space<vmem>>, vector<1x8x48xf32>
      %23 = vector.shape_cast %22 : vector<1x8x48xf32> to vector<8x48xf32>
      %c1 = arith.constant 1 : index
      %c0_19 = arith.constant 0 : index
      %c0_20 = arith.constant 0 : index
      %24 = vector.load %arg2[%c1, %c0_19, %c0_20] : memref<25x48x32xf32, #tpu.memory_space<vmem>>, vector<1x48x32xf32>
      %25 = vector.shape_cast %24 : vector<1x48x32xf32> to vector<48x32xf32>
      %cst_21 = arith.constant dense<0.000000e+00> : vector<8x32xf32>
      %26 = tpu.matmul %23, %25, %cst_21 {dimension_numbers = #tpu.dot_dimension_numbers<[1], [0], [0], [1], [0, 0, 1, 1], [], []>} : vector<8x48xf32>, vector<48x32xf32>, vector<8x32xf32> -> vector<8x32xf32>
      %27 = arith.addf %17, %26 : vector<8x32xf32>
      %c0_i32_22 = arith.constant 0 : i32
      %28 = arith.addi %6, %c0_i32_22 : i32
      %c12_i32_23 = arith.constant 12 : i32
      %29 = arith.muli %28, %c12_i32_23 : i32
      %c2_i32 = arith.constant 2 : i32
      %30 = arith.addi %29, %c2_i32 : i32
      %c0_24 = arith.constant 0 : index
      %31 = arith.index_cast %30 : i32 to index
      %c0_25 = arith.constant 0 : index
      %32 = vector.load %arg1[%c0_24, %31, %c0_25] : memref<1x144x48xf32, #tpu.memory_space<vmem>>, vector<1x8x48xf32>
      %33 = vector.shape_cast %32 : vector<1x8x48xf32> to vector<8x48xf32>
      %c2 = arith.constant 2 : index
      %c0_26 = arith.constant 0 : index
      %c0_27 = arith.constant 0 : index
      %34 = vector.load %arg2[%c2, %c0_26, %c0_27] : memref<25x48x32xf32, #tpu.memory_space<vmem>>, vector<1x48x32xf32>
      %35 = vector.shape_cast %34 : vector<1x48x32xf32> to vector<48x32xf32>
      %cst_28 = arith.constant dense<0.000000e+00> : vector<8x32xf32>
      %36 = tpu.matmul %33, %35, %cst_28 {dimension_numbers = #tpu.dot_dimension_numbers<[1], [0], [0], [1], [0, 0, 1, 1], [], []>} : vector<8x48xf32>, vector<48x32xf32>, vector<8x32xf32> -> vector<8x32xf32>
      %37 = arith.addf %27, %36 : vector<8x32xf32>
      %c0_i32_29 = arith.constant 0 : i32
      %38 = arith.addi %6, %c0_i32_29 : i32
      %c12_i32_30 = arith.constant 12 : i32
      %39 = arith.muli %38, %c12_i32_30 : i32
      %c3_i32 = arith.constant 3 : i32
      %40 = arith.addi %39, %c3_i32 : i32
      %c0_31 = arith.constant 0 : index
      %41 = arith.index_cast %40 : i32 to index
      %c0_32 = arith.constant 0 : index
      %42 = vector.load %arg1[%c0_31, %41, %c0_32] : memref<1x144x48xf32, #tpu.memory_space<vmem>>, vector<1x8x48xf32>
      %43 = vector.shape_cast %42 : vector<1x8x48xf32> to vector<8x48xf32>
      %c3 = arith.constant 3 : index
      %c0_33 = arith.constant 0 : index
      %c0_34 = arith.constant 0 : index
      %44 = vector.load %arg2[%c3, %c0_33, %c0_34] : memref<25x48x32xf32, #tpu.memory_space<vmem>>, vector<1x48x32xf32>
      %45 = vector.shape_cast %44 : vector<1x48x32xf32> to vector<48x32xf32>
      %cst_35 = arith.constant dense<0.000000e+00> : vector<8x32xf32>
      %46 = tpu.matmul %43, %45, %cst_35 {dimension_numbers = #tpu.dot_dimension_numbers<[1], [0], [0], [1], [0, 0, 1, 1], [], []>} : vector<8x48xf32>, vector<48x32xf32>, vector<8x32xf32> -> vector<8x32xf32>
      %47 = arith.addf %37, %46 : vector<8x32xf32>
      %c0_i32_36 = arith.constant 0 : i32
      %48 = arith.addi %6, %c0_i32_36 : i32
      %c12_i32_37 = arith.constant 12 : i32
      %49 = arith.muli %48, %c12_i32_37 : i32
      %c4_i32 = arith.constant 4 : i32
      %50 = arith.addi %49, %c4_i32 : i32
      %c0_38 = arith.constant 0 : index
      %51 = arith.index_cast %50 : i32 to index
      %c0_39 = arith.constant 0 : index
      %52 = vector.load %arg1[%c0_38, %51, %c0_39] : memref<1x144x48xf32, #tpu.memory_space<vmem>>, vector<1x8x48xf32>
      %53 = vector.shape_cast %52 : vector<1x8x48xf32> to vector<8x48xf32>
      %c4 = arith.constant 4 : index
      %c0_40 = arith.constant 0 : index
      %c0_41 = arith.constant 0 : index
      %54 = vector.load %arg2[%c4, %c0_40, %c0_41] : memref<25x48x32xf32, #tpu.memory_space<vmem>>, vector<1x48x32xf32>
      %55 = vector.shape_cast %54 : vector<1x48x32xf32> to vector<48x32xf32>
      %cst_42 = arith.constant dense<0.000000e+00> : vector<8x32xf32>
      %56 = tpu.matmul %53, %55, %cst_42 {dimension_numbers = #tpu.dot_dimension_numbers<[1], [0], [0], [1], [0, 0, 1, 1], [], []>} : vector<8x48xf32>, vector<48x32xf32>, vector<8x32xf32> -> vector<8x32xf32>
      %57 = arith.addf %47, %56 : vector<8x32xf32>
      %c1_i32_43 = arith.constant 1 : i32
      %58 = arith.addi %6, %c1_i32_43 : i32
      %c12_i32_44 = arith.constant 12 : i32
      %59 = arith.muli %58, %c12_i32_44 : i32
      %c0_i32_45 = arith.constant 0 : i32
      %60 = arith.addi %59, %c0_i32_45 : i32
      %c0_46 = arith.constant 0 : index
      %61 = arith.index_cast %60 : i32 to index
      %c0_47 = arith.constant 0 : index
      %62 = vector.load %arg1[%c0_46, %61, %c0_47] : memref<1x144x48xf32, #tpu.memory_space<vmem>>, vector<1x8x48xf32>
      %63 = vector.shape_cast %62 : vector<1x8x48xf32> to vector<8x48xf32>
      %c5 = arith.constant 5 : index
      %c0_48 = arith.constant 0 : index
      %c0_49 = arith.constant 0 : index
      %64 = vector.load %arg2[%c5, %c0_48, %c0_49] : memref<25x48x32xf32, #tpu.memory_space<vmem>>, vector<1x48x32xf32>
      %65 = vector.shape_cast %64 : vector<1x48x32xf32> to vector<48x32xf32>
      %cst_50 = arith.constant dense<0.000000e+00> : vector<8x32xf32>
      %66 = tpu.matmul %63, %65, %cst_50 {dimension_numbers = #tpu.dot_dimension_numbers<[1], [0], [0], [1], [0, 0, 1, 1], [], []>} : vector<8x48xf32>, vector<48x32xf32>, vector<8x32xf32> -> vector<8x32xf32>
      %67 = arith.addf %57, %66 : vector<8x32xf32>
      %c1_i32_51 = arith.constant 1 : i32
      %68 = arith.addi %6, %c1_i32_51 : i32
      %c12_i32_52 = arith.constant 12 : i32
      %69 = arith.muli %68, %c12_i32_52 : i32
      %c1_i32_53 = arith.constant 1 : i32
      %70 = arith.addi %69, %c1_i32_53 : i32
      %c0_54 = arith.constant 0 : index
      %71 = arith.index_cast %70 : i32 to index
      %c0_55 = arith.constant 0 : index
      %72 = vector.load %arg1[%c0_54, %71, %c0_55] : memref<1x144x48xf32, #tpu.memory_space<vmem>>, vector<1x8x48xf32>
      %73 = vector.shape_cast %72 : vector<1x8x48xf32> to vector<8x48xf32>
      %c6 = arith.constant 6 : index
      %c0_56 = arith.constant 0 : index
      %c0_57 = arith.constant 0 : index
      %74 = vector.load %arg2[%c6, %c0_56, %c0_57] : memref<25x48x32xf32, #tpu.memory_space<vmem>>, vector<1x48x32xf32>
      %75 = vector.shape_cast %74 : vector<1x48x32xf32> to vector<48x32xf32>
      %cst_58 = arith.constant dense<0.000000e+00> : vector<8x32xf32>
      %76 = tpu.matmul %73, %75, %cst_58 {dimension_numbers = #tpu.dot_dimension_numbers<[1], [0], [0], [1], [0, 0, 1, 1], [], []>} : vector<8x48xf32>, vector<48x32xf32>, vector<8x32xf32> -> vector<8x32xf32>
      %77 = arith.addf %67, %76 : vector<8x32xf32>
      %c1_i32_59 = arith.constant 1 : i32
      %78 = arith.addi %6, %c1_i32_59 : i32
      %c12_i32_60 = arith.constant 12 : i32
      %79 = arith.muli %78, %c12_i32_60 : i32
      %c2_i32_61 = arith.constant 2 : i32
      %80 = arith.addi %79, %c2_i32_61 : i32
      %c0_62 = arith.constant 0 : index
      %81 = arith.index_cast %80 : i32 to index
      %c0_63 = arith.constant 0 : index
      %82 = vector.load %arg1[%c0_62, %81, %c0_63] : memref<1x144x48xf32, #tpu.memory_space<vmem>>, vector<1x8x48xf32>
      %83 = vector.shape_cast %82 : vector<1x8x48xf32> to vector<8x48xf32>
      %c7 = arith.constant 7 : index
      %c0_64 = arith.constant 0 : index
      %c0_65 = arith.constant 0 : index
      %84 = vector.load %arg2[%c7, %c0_64, %c0_65] : memref<25x48x32xf32, #tpu.memory_space<vmem>>, vector<1x48x32xf32>
      %85 = vector.shape_cast %84 : vector<1x48x32xf32> to vector<48x32xf32>
      %cst_66 = arith.constant dense<0.000000e+00> : vector<8x32xf32>
      %86 = tpu.matmul %83, %85, %cst_66 {dimension_numbers = #tpu.dot_dimension_numbers<[1], [0], [0], [1], [0, 0, 1, 1], [], []>} : vector<8x48xf32>, vector<48x32xf32>, vector<8x32xf32> -> vector<8x32xf32>
      %87 = arith.addf %77, %86 : vector<8x32xf32>
      %c1_i32_67 = arith.constant 1 : i32
      %88 = arith.addi %6, %c1_i32_67 : i32
      %c12_i32_68 = arith.constant 12 : i32
      %89 = arith.muli %88, %c12_i32_68 : i32
      %c3_i32_69 = arith.constant 3 : i32
      %90 = arith.addi %89, %c3_i32_69 : i32
      %c0_70 = arith.constant 0 : index
      %91 = arith.index_cast %90 : i32 to index
      %c0_71 = arith.constant 0 : index
      %92 = vector.load %arg1[%c0_70, %91, %c0_71] : memref<1x144x48xf32, #tpu.memory_space<vmem>>, vector<1x8x48xf32>
      %93 = vector.shape_cast %92 : vector<1x8x48xf32> to vector<8x48xf32>
      %c8 = arith.constant 8 : index
      %c0_72 = arith.constant 0 : index
      %c0_73 = arith.constant 0 : index
      %94 = vector.load %arg2[%c8, %c0_72, %c0_73] : memref<25x48x32xf32, #tpu.memory_space<vmem>>, vector<1x48x32xf32>
      %95 = vector.shape_cast %94 : vector<1x48x32xf32> to vector<48x32xf32>
      %cst_74 = arith.constant dense<0.000000e+00> : vector<8x32xf32>
      %96 = tpu.matmul %93, %95, %cst_74 {dimension_numbers = #tpu.dot_dimension_numbers<[1], [0], [0], [1], [0, 0, 1, 1], [], []>} : vector<8x48xf32>, vector<48x32xf32>, vector<8x32xf32> -> vector<8x32xf32>
      %97 = arith.addf %87, %96 : vector<8x32xf32>
      %c1_i32_75 = arith.constant 1 : i32
      %98 = arith.addi %6, %c1_i32_75 : i32
      %c12_i32_76 = arith.constant 12 : i32
      %99 = arith.muli %98, %c12_i32_76 : i32
      %c4_i32_77 = arith.constant 4 : i32
      %100 = arith.addi %99, %c4_i32_77 : i32
      %c0_78 = arith.constant 0 : index
      %101 = arith.index_cast %100 : i32 to index
      %c0_79 = arith.constant 0 : index
      %102 = vector.load %arg1[%c0_78, %101, %c0_79] : memref<1x144x48xf32, #tpu.memory_space<vmem>>, vector<1x8x48xf32>
      %103 = vector.shape_cast %102 : vector<1x8x48xf32> to vector<8x48xf32>
      %c9 = arith.constant 9 : index
      %c0_80 = arith.constant 0 : index
      %c0_81 = arith.constant 0 : index
      %104 = vector.load %arg2[%c9, %c0_80, %c0_81] : memref<25x48x32xf32, #tpu.memory_space<vmem>>, vector<1x48x32xf32>
      %105 = vector.shape_cast %104 : vector<1x48x32xf32> to vector<48x32xf32>
      %cst_82 = arith.constant dense<0.000000e+00> : vector<8x32xf32>
      %106 = tpu.matmul %103, %105, %cst_82 {dimension_numbers = #tpu.dot_dimension_numbers<[1], [0], [0], [1], [0, 0, 1, 1], [], []>} : vector<8x48xf32>, vector<48x32xf32>, vector<8x32xf32> -> vector<8x32xf32>
      %107 = arith.addf %97, %106 : vector<8x32xf32>
      %c2_i32_83 = arith.constant 2 : i32
      %108 = arith.addi %6, %c2_i32_83 : i32
      %c12_i32_84 = arith.constant 12 : i32
      %109 = arith.muli %108, %c12_i32_84 : i32
      %c0_i32_85 = arith.constant 0 : i32
      %110 = arith.addi %109, %c0_i32_85 : i32
      %c0_86 = arith.constant 0 : index
      %111 = arith.index_cast %110 : i32 to index
      %c0_87 = arith.constant 0 : index
      %112 = vector.load %arg1[%c0_86, %111, %c0_87] : memref<1x144x48xf32, #tpu.memory_space<vmem>>, vector<1x8x48xf32>
      %113 = vector.shape_cast %112 : vector<1x8x48xf32> to vector<8x48xf32>
      %c10 = arith.constant 10 : index
      %c0_88 = arith.constant 0 : index
      %c0_89 = arith.constant 0 : index
      %114 = vector.load %arg2[%c10, %c0_88, %c0_89] : memref<25x48x32xf32, #tpu.memory_space<vmem>>, vector<1x48x32xf32>
      %115 = vector.shape_cast %114 : vector<1x48x32xf32> to vector<48x32xf32>
      %cst_90 = arith.constant dense<0.000000e+00> : vector<8x32xf32>
      %116 = tpu.matmul %113, %115, %cst_90 {dimension_numbers = #tpu.dot_dimension_numbers<[1], [0], [0], [1], [0, 0, 1, 1], [], []>} : vector<8x48xf32>, vector<48x32xf32>, vector<8x32xf32> -> vector<8x32xf32>
      %117 = arith.addf %107, %116 : vector<8x32xf32>
      %c2_i32_91 = arith.constant 2 : i32
      %118 = arith.addi %6, %c2_i32_91 : i32
      %c12_i32_92 = arith.constant 12 : i32
      %119 = arith.muli %118, %c12_i32_92 : i32
      %c1_i32_93 = arith.constant 1 : i32
      %120 = arith.addi %119, %c1_i32_93 : i32
      %c0_94 = arith.constant 0 : index
      %121 = arith.index_cast %120 : i32 to index
      %c0_95 = arith.constant 0 : index
      %122 = vector.load %arg1[%c0_94, %121, %c0_95] : memref<1x144x48xf32, #tpu.memory_space<vmem>>, vector<1x8x48xf32>
      %123 = vector.shape_cast %122 : vector<1x8x48xf32> to vector<8x48xf32>
      %c11 = arith.constant 11 : index
      %c0_96 = arith.constant 0 : index
      %c0_97 = arith.constant 0 : index
      %124 = vector.load %arg2[%c11, %c0_96, %c0_97] : memref<25x48x32xf32, #tpu.memory_space<vmem>>, vector<1x48x32xf32>
      %125 = vector.shape_cast %124 : vector<1x48x32xf32> to vector<48x32xf32>
      %cst_98 = arith.constant dense<0.000000e+00> : vector<8x32xf32>
      %126 = tpu.matmul %123, %125, %cst_98 {dimension_numbers = #tpu.dot_dimension_numbers<[1], [0], [0], [1], [0, 0, 1, 1], [], []>} : vector<8x48xf32>, vector<48x32xf32>, vector<8x32xf32> -> vector<8x32xf32>
      %127 = arith.addf %117, %126 : vector<8x32xf32>
      %c2_i32_99 = arith.constant 2 : i32
      %128 = arith.addi %6, %c2_i32_99 : i32
      %c12_i32_100 = arith.constant 12 : i32
      %129 = arith.muli %128, %c12_i32_100 : i32
      %c2_i32_101 = arith.constant 2 : i32
      %130 = arith.addi %129, %c2_i32_101 : i32
      %c0_102 = arith.constant 0 : index
      %131 = arith.index_cast %130 : i32 to index
      %c0_103 = arith.constant 0 : index
      %132 = vector.load %arg1[%c0_102, %131, %c0_103] : memref<1x144x48xf32, #tpu.memory_space<vmem>>, vector<1x8x48xf32>
      %133 = vector.shape_cast %132 : vector<1x8x48xf32> to vector<8x48xf32>
      %c12 = arith.constant 12 : index
      %c0_104 = arith.constant 0 : index
      %c0_105 = arith.constant 0 : index
      %134 = vector.load %arg2[%c12, %c0_104, %c0_105] : memref<25x48x32xf32, #tpu.memory_space<vmem>>, vector<1x48x32xf32>
      %135 = vector.shape_cast %134 : vector<1x48x32xf32> to vector<48x32xf32>
      %cst_106 = arith.constant dense<0.000000e+00> : vector<8x32xf32>
      %136 = tpu.matmul %133, %135, %cst_106 {dimension_numbers = #tpu.dot_dimension_numbers<[1], [0], [0], [1], [0, 0, 1, 1], [], []>} : vector<8x48xf32>, vector<48x32xf32>, vector<8x32xf32> -> vector<8x32xf32>
      %137 = arith.addf %127, %136 : vector<8x32xf32>
      %c2_i32_107 = arith.constant 2 : i32
      %138 = arith.addi %6, %c2_i32_107 : i32
      %c12_i32_108 = arith.constant 12 : i32
      %139 = arith.muli %138, %c12_i32_108 : i32
      %c3_i32_109 = arith.constant 3 : i32
      %140 = arith.addi %139, %c3_i32_109 : i32
      %c0_110 = arith.constant 0 : index
      %141 = arith.index_cast %140 : i32 to index
      %c0_111 = arith.constant 0 : index
      %142 = vector.load %arg1[%c0_110, %141, %c0_111] : memref<1x144x48xf32, #tpu.memory_space<vmem>>, vector<1x8x48xf32>
      %143 = vector.shape_cast %142 : vector<1x8x48xf32> to vector<8x48xf32>
      %c13 = arith.constant 13 : index
      %c0_112 = arith.constant 0 : index
      %c0_113 = arith.constant 0 : index
      %144 = vector.load %arg2[%c13, %c0_112, %c0_113] : memref<25x48x32xf32, #tpu.memory_space<vmem>>, vector<1x48x32xf32>
      %145 = vector.shape_cast %144 : vector<1x48x32xf32> to vector<48x32xf32>
      %cst_114 = arith.constant dense<0.000000e+00> : vector<8x32xf32>
      %146 = tpu.matmul %143, %145, %cst_114 {dimension_numbers = #tpu.dot_dimension_numbers<[1], [0], [0], [1], [0, 0, 1, 1], [], []>} : vector<8x48xf32>, vector<48x32xf32>, vector<8x32xf32> -> vector<8x32xf32>
      %147 = arith.addf %137, %146 : vector<8x32xf32>
      %c2_i32_115 = arith.constant 2 : i32
      %148 = arith.addi %6, %c2_i32_115 : i32
      %c12_i32_116 = arith.constant 12 : i32
      %149 = arith.muli %148, %c12_i32_116 : i32
      %c4_i32_117 = arith.constant 4 : i32
      %150 = arith.addi %149, %c4_i32_117 : i32
      %c0_118 = arith.constant 0 : index
      %151 = arith.index_cast %150 : i32 to index
      %c0_119 = arith.constant 0 : index
      %152 = vector.load %arg1[%c0_118, %151, %c0_119] : memref<1x144x48xf32, #tpu.memory_space<vmem>>, vector<1x8x48xf32>
      %153 = vector.shape_cast %152 : vector<1x8x48xf32> to vector<8x48xf32>
      %c14 = arith.constant 14 : index
      %c0_120 = arith.constant 0 : index
      %c0_121 = arith.constant 0 : index
      %154 = vector.load %arg2[%c14, %c0_120, %c0_121] : memref<25x48x32xf32, #tpu.memory_space<vmem>>, vector<1x48x32xf32>
      %155 = vector.shape_cast %154 : vector<1x48x32xf32> to vector<48x32xf32>
      %cst_122 = arith.constant dense<0.000000e+00> : vector<8x32xf32>
      %156 = tpu.matmul %153, %155, %cst_122 {dimension_numbers = #tpu.dot_dimension_numbers<[1], [0], [0], [1], [0, 0, 1, 1], [], []>} : vector<8x48xf32>, vector<48x32xf32>, vector<8x32xf32> -> vector<8x32xf32>
      %157 = arith.addf %147, %156 : vector<8x32xf32>
      %c3_i32_123 = arith.constant 3 : i32
      %158 = arith.addi %6, %c3_i32_123 : i32
      %c12_i32_124 = arith.constant 12 : i32
      %159 = arith.muli %158, %c12_i32_124 : i32
      %c0_i32_125 = arith.constant 0 : i32
      %160 = arith.addi %159, %c0_i32_125 : i32
      %c0_126 = arith.constant 0 : index
      %161 = arith.index_cast %160 : i32 to index
      %c0_127 = arith.constant 0 : index
      %162 = vector.load %arg1[%c0_126, %161, %c0_127] : memref<1x144x48xf32, #tpu.memory_space<vmem>>, vector<1x8x48xf32>
      %163 = vector.shape_cast %162 : vector<1x8x48xf32> to vector<8x48xf32>
      %c15 = arith.constant 15 : index
      %c0_128 = arith.constant 0 : index
      %c0_129 = arith.constant 0 : index
      %164 = vector.load %arg2[%c15, %c0_128, %c0_129] : memref<25x48x32xf32, #tpu.memory_space<vmem>>, vector<1x48x32xf32>
      %165 = vector.shape_cast %164 : vector<1x48x32xf32> to vector<48x32xf32>
      %cst_130 = arith.constant dense<0.000000e+00> : vector<8x32xf32>
      %166 = tpu.matmul %163, %165, %cst_130 {dimension_numbers = #tpu.dot_dimension_numbers<[1], [0], [0], [1], [0, 0, 1, 1], [], []>} : vector<8x48xf32>, vector<48x32xf32>, vector<8x32xf32> -> vector<8x32xf32>
      %167 = arith.addf %157, %166 : vector<8x32xf32>
      %c3_i32_131 = arith.constant 3 : i32
      %168 = arith.addi %6, %c3_i32_131 : i32
      %c12_i32_132 = arith.constant 12 : i32
      %169 = arith.muli %168, %c12_i32_132 : i32
      %c1_i32_133 = arith.constant 1 : i32
      %170 = arith.addi %169, %c1_i32_133 : i32
      %c0_134 = arith.constant 0 : index
      %171 = arith.index_cast %170 : i32 to index
      %c0_135 = arith.constant 0 : index
      %172 = vector.load %arg1[%c0_134, %171, %c0_135] : memref<1x144x48xf32, #tpu.memory_space<vmem>>, vector<1x8x48xf32>
      %173 = vector.shape_cast %172 : vector<1x8x48xf32> to vector<8x48xf32>
      %c16 = arith.constant 16 : index
      %c0_136 = arith.constant 0 : index
      %c0_137 = arith.constant 0 : index
      %174 = vector.load %arg2[%c16, %c0_136, %c0_137] : memref<25x48x32xf32, #tpu.memory_space<vmem>>, vector<1x48x32xf32>
      %175 = vector.shape_cast %174 : vector<1x48x32xf32> to vector<48x32xf32>
      %cst_138 = arith.constant dense<0.000000e+00> : vector<8x32xf32>
      %176 = tpu.matmul %173, %175, %cst_138 {dimension_numbers = #tpu.dot_dimension_numbers<[1], [0], [0], [1], [0, 0, 1, 1], [], []>} : vector<8x48xf32>, vector<48x32xf32>, vector<8x32xf32> -> vector<8x32xf32>
      %177 = arith.addf %167, %176 : vector<8x32xf32>
      %c3_i32_139 = arith.constant 3 : i32
      %178 = arith.addi %6, %c3_i32_139 : i32
      %c12_i32_140 = arith.constant 12 : i32
      %179 = arith.muli %178, %c12_i32_140 : i32
      %c2_i32_141 = arith.constant 2 : i32
      %180 = arith.addi %179, %c2_i32_141 : i32
      %c0_142 = arith.constant 0 : index
      %181 = arith.index_cast %180 : i32 to index
      %c0_143 = arith.constant 0 : index
      %182 = vector.load %arg1[%c0_142, %181, %c0_143] : memref<1x144x48xf32, #tpu.memory_space<vmem>>, vector<1x8x48xf32>
      %183 = vector.shape_cast %182 : vector<1x8x48xf32> to vector<8x48xf32>
      %c17 = arith.constant 17 : index
      %c0_144 = arith.constant 0 : index
      %c0_145 = arith.constant 0 : index
      %184 = vector.load %arg2[%c17, %c0_144, %c0_145] : memref<25x48x32xf32, #tpu.memory_space<vmem>>, vector<1x48x32xf32>
      %185 = vector.shape_cast %184 : vector<1x48x32xf32> to vector<48x32xf32>
      %cst_146 = arith.constant dense<0.000000e+00> : vector<8x32xf32>
      %186 = tpu.matmul %183, %185, %cst_146 {dimension_numbers = #tpu.dot_dimension_numbers<[1], [0], [0], [1], [0, 0, 1, 1], [], []>} : vector<8x48xf32>, vector<48x32xf32>, vector<8x32xf32> -> vector<8x32xf32>
      %187 = arith.addf %177, %186 : vector<8x32xf32>
      %c3_i32_147 = arith.constant 3 : i32
      %188 = arith.addi %6, %c3_i32_147 : i32
      %c12_i32_148 = arith.constant 12 : i32
      %189 = arith.muli %188, %c12_i32_148 : i32
      %c3_i32_149 = arith.constant 3 : i32
      %190 = arith.addi %189, %c3_i32_149 : i32
      %c0_150 = arith.constant 0 : index
      %191 = arith.index_cast %190 : i32 to index
      %c0_151 = arith.constant 0 : index
      %192 = vector.load %arg1[%c0_150, %191, %c0_151] : memref<1x144x48xf32, #tpu.memory_space<vmem>>, vector<1x8x48xf32>
      %193 = vector.shape_cast %192 : vector<1x8x48xf32> to vector<8x48xf32>
      %c18 = arith.constant 18 : index
      %c0_152 = arith.constant 0 : index
      %c0_153 = arith.constant 0 : index
      %194 = vector.load %arg2[%c18, %c0_152, %c0_153] : memref<25x48x32xf32, #tpu.memory_space<vmem>>, vector<1x48x32xf32>
      %195 = vector.shape_cast %194 : vector<1x48x32xf32> to vector<48x32xf32>
      %cst_154 = arith.constant dense<0.000000e+00> : vector<8x32xf32>
      %196 = tpu.matmul %193, %195, %cst_154 {dimension_numbers = #tpu.dot_dimension_numbers<[1], [0], [0], [1], [0, 0, 1, 1], [], []>} : vector<8x48xf32>, vector<48x32xf32>, vector<8x32xf32> -> vector<8x32xf32>
      %197 = arith.addf %187, %196 : vector<8x32xf32>
      %c3_i32_155 = arith.constant 3 : i32
      %198 = arith.addi %6, %c3_i32_155 : i32
      %c12_i32_156 = arith.constant 12 : i32
      %199 = arith.muli %198, %c12_i32_156 : i32
      %c4_i32_157 = arith.constant 4 : i32
      %200 = arith.addi %199, %c4_i32_157 : i32
      %c0_158 = arith.constant 0 : index
      %201 = arith.index_cast %200 : i32 to index
      %c0_159 = arith.constant 0 : index
      %202 = vector.load %arg1[%c0_158, %201, %c0_159] : memref<1x144x48xf32, #tpu.memory_space<vmem>>, vector<1x8x48xf32>
      %203 = vector.shape_cast %202 : vector<1x8x48xf32> to vector<8x48xf32>
      %c19 = arith.constant 19 : index
      %c0_160 = arith.constant 0 : index
      %c0_161 = arith.constant 0 : index
      %204 = vector.load %arg2[%c19, %c0_160, %c0_161] : memref<25x48x32xf32, #tpu.memory_space<vmem>>, vector<1x48x32xf32>
      %205 = vector.shape_cast %204 : vector<1x48x32xf32> to vector<48x32xf32>
      %cst_162 = arith.constant dense<0.000000e+00> : vector<8x32xf32>
      %206 = tpu.matmul %203, %205, %cst_162 {dimension_numbers = #tpu.dot_dimension_numbers<[1], [0], [0], [1], [0, 0, 1, 1], [], []>} : vector<8x48xf32>, vector<48x32xf32>, vector<8x32xf32> -> vector<8x32xf32>
      %207 = arith.addf %197, %206 : vector<8x32xf32>
      %c4_i32_163 = arith.constant 4 : i32
      %208 = arith.addi %6, %c4_i32_163 : i32
      %c12_i32_164 = arith.constant 12 : i32
      %209 = arith.muli %208, %c12_i32_164 : i32
      %c0_i32_165 = arith.constant 0 : i32
      %210 = arith.addi %209, %c0_i32_165 : i32
      %c0_166 = arith.constant 0 : index
      %211 = arith.index_cast %210 : i32 to index
      %c0_167 = arith.constant 0 : index
      %212 = vector.load %arg1[%c0_166, %211, %c0_167] : memref<1x144x48xf32, #tpu.memory_space<vmem>>, vector<1x8x48xf32>
      %213 = vector.shape_cast %212 : vector<1x8x48xf32> to vector<8x48xf32>
      %c20 = arith.constant 20 : index
      %c0_168 = arith.constant 0 : index
      %c0_169 = arith.constant 0 : index
      %214 = vector.load %arg2[%c20, %c0_168, %c0_169] : memref<25x48x32xf32, #tpu.memory_space<vmem>>, vector<1x48x32xf32>
      %215 = vector.shape_cast %214 : vector<1x48x32xf32> to vector<48x32xf32>
      %cst_170 = arith.constant dense<0.000000e+00> : vector<8x32xf32>
      %216 = tpu.matmul %213, %215, %cst_170 {dimension_numbers = #tpu.dot_dimension_numbers<[1], [0], [0], [1], [0, 0, 1, 1], [], []>} : vector<8x48xf32>, vector<48x32xf32>, vector<8x32xf32> -> vector<8x32xf32>
      %217 = arith.addf %207, %216 : vector<8x32xf32>
      %c4_i32_171 = arith.constant 4 : i32
      %218 = arith.addi %6, %c4_i32_171 : i32
      %c12_i32_172 = arith.constant 12 : i32
      %219 = arith.muli %218, %c12_i32_172 : i32
      %c1_i32_173 = arith.constant 1 : i32
      %220 = arith.addi %219, %c1_i32_173 : i32
      %c0_174 = arith.constant 0 : index
      %221 = arith.index_cast %220 : i32 to index
      %c0_175 = arith.constant 0 : index
      %222 = vector.load %arg1[%c0_174, %221, %c0_175] : memref<1x144x48xf32, #tpu.memory_space<vmem>>, vector<1x8x48xf32>
      %223 = vector.shape_cast %222 : vector<1x8x48xf32> to vector<8x48xf32>
      %c21 = arith.constant 21 : index
      %c0_176 = arith.constant 0 : index
      %c0_177 = arith.constant 0 : index
      %224 = vector.load %arg2[%c21, %c0_176, %c0_177] : memref<25x48x32xf32, #tpu.memory_space<vmem>>, vector<1x48x32xf32>
      %225 = vector.shape_cast %224 : vector<1x48x32xf32> to vector<48x32xf32>
      %cst_178 = arith.constant dense<0.000000e+00> : vector<8x32xf32>
      %226 = tpu.matmul %223, %225, %cst_178 {dimension_numbers = #tpu.dot_dimension_numbers<[1], [0], [0], [1], [0, 0, 1, 1], [], []>} : vector<8x48xf32>, vector<48x32xf32>, vector<8x32xf32> -> vector<8x32xf32>
      %227 = arith.addf %217, %226 : vector<8x32xf32>
      %c4_i32_179 = arith.constant 4 : i32
      %228 = arith.addi %6, %c4_i32_179 : i32
      %c12_i32_180 = arith.constant 12 : i32
      %229 = arith.muli %228, %c12_i32_180 : i32
      %c2_i32_181 = arith.constant 2 : i32
      %230 = arith.addi %229, %c2_i32_181 : i32
      %c0_182 = arith.constant 0 : index
      %231 = arith.index_cast %230 : i32 to index
      %c0_183 = arith.constant 0 : index
      %232 = vector.load %arg1[%c0_182, %231, %c0_183] : memref<1x144x48xf32, #tpu.memory_space<vmem>>, vector<1x8x48xf32>
      %233 = vector.shape_cast %232 : vector<1x8x48xf32> to vector<8x48xf32>
      %c22 = arith.constant 22 : index
      %c0_184 = arith.constant 0 : index
      %c0_185 = arith.constant 0 : index
      %234 = vector.load %arg2[%c22, %c0_184, %c0_185] : memref<25x48x32xf32, #tpu.memory_space<vmem>>, vector<1x48x32xf32>
      %235 = vector.shape_cast %234 : vector<1x48x32xf32> to vector<48x32xf32>
      %cst_186 = arith.constant dense<0.000000e+00> : vector<8x32xf32>
      %236 = tpu.matmul %233, %235, %cst_186 {dimension_numbers = #tpu.dot_dimension_numbers<[1], [0], [0], [1], [0, 0, 1, 1], [], []>} : vector<8x48xf32>, vector<48x32xf32>, vector<8x32xf32> -> vector<8x32xf32>
      %237 = arith.addf %227, %236 : vector<8x32xf32>
      %c4_i32_187 = arith.constant 4 : i32
      %238 = arith.addi %6, %c4_i32_187 : i32
      %c12_i32_188 = arith.constant 12 : i32
      %239 = arith.muli %238, %c12_i32_188 : i32
      %c3_i32_189 = arith.constant 3 : i32
      %240 = arith.addi %239, %c3_i32_189 : i32
      %c0_190 = arith.constant 0 : index
      %241 = arith.index_cast %240 : i32 to index
      %c0_191 = arith.constant 0 : index
      %242 = vector.load %arg1[%c0_190, %241, %c0_191] : memref<1x144x48xf32, #tpu.memory_space<vmem>>, vector<1x8x48xf32>
      %243 = vector.shape_cast %242 : vector<1x8x48xf32> to vector<8x48xf32>
      %c23 = arith.constant 23 : index
      %c0_192 = arith.constant 0 : index
      %c0_193 = arith.constant 0 : index
      %244 = vector.load %arg2[%c23, %c0_192, %c0_193] : memref<25x48x32xf32, #tpu.memory_space<vmem>>, vector<1x48x32xf32>
      %245 = vector.shape_cast %244 : vector<1x48x32xf32> to vector<48x32xf32>
      %cst_194 = arith.constant dense<0.000000e+00> : vector<8x32xf32>
      %246 = tpu.matmul %243, %245, %cst_194 {dimension_numbers = #tpu.dot_dimension_numbers<[1], [0], [0], [1], [0, 0, 1, 1], [], []>} : vector<8x48xf32>, vector<48x32xf32>, vector<8x32xf32> -> vector<8x32xf32>
      %247 = arith.addf %237, %246 : vector<8x32xf32>
      %c4_i32_195 = arith.constant 4 : i32
      %248 = arith.addi %6, %c4_i32_195 : i32
      %c12_i32_196 = arith.constant 12 : i32
      %249 = arith.muli %248, %c12_i32_196 : i32
      %c4_i32_197 = arith.constant 4 : i32
      %250 = arith.addi %249, %c4_i32_197 : i32
      %c0_198 = arith.constant 0 : index
      %251 = arith.index_cast %250 : i32 to index
      %c0_199 = arith.constant 0 : index
      %252 = vector.load %arg1[%c0_198, %251, %c0_199] : memref<1x144x48xf32, #tpu.memory_space<vmem>>, vector<1x8x48xf32>
      %253 = vector.shape_cast %252 : vector<1x8x48xf32> to vector<8x48xf32>
      %c24 = arith.constant 24 : index
      %c0_200 = arith.constant 0 : index
      %c0_201 = arith.constant 0 : index
      %254 = vector.load %arg2[%c24, %c0_200, %c0_201] : memref<25x48x32xf32, #tpu.memory_space<vmem>>, vector<1x48x32xf32>
      %255 = vector.shape_cast %254 : vector<1x48x32xf32> to vector<48x32xf32>
      %cst_202 = arith.constant dense<0.000000e+00> : vector<8x32xf32>
      %256 = tpu.matmul %253, %255, %cst_202 {dimension_numbers = #tpu.dot_dimension_numbers<[1], [0], [0], [1], [0, 0, 1, 1], [], []>} : vector<8x48xf32>, vector<48x32xf32>, vector<8x32xf32> -> vector<8x32xf32>
      %257 = arith.addf %247, %256 : vector<8x32xf32>
      %c0_203 = arith.constant 0 : index
      %c0_204 = arith.constant 0 : index
      %258 = vector.load %arg3[%c0_203, %c0_204] : memref<1x32xf32, #tpu.memory_space<vmem>>, vector<1x32xf32>
      %259 = vector.broadcast %258 : vector<1x32xf32> to vector<8x32xf32>
      %260 = arith.addf %257, %259 : vector<8x32xf32>
      %c8_i32_205 = arith.constant 8 : i32
      %261 = arith.muli %6, %c8_i32_205 : i32
      %262 = tpu.assume_multiple %261, 8 : i32
      %c0_206 = arith.constant 0 : index
      %263 = arith.index_cast %262 : i32 to index
      %c0_207 = arith.constant 0 : index
      %264 = vector.load %arg4[%c0_206, %263, %c0_207] : memref<1x64x32xf32, #tpu.memory_space<vmem>>, vector<1x8x32xf32>
      %265 = vector.shape_cast %264 : vector<1x8x32xf32> to vector<8x32xf32>
      %266 = vector.shape_cast %260 : vector<8x32xf32> to vector<1x8x32xf32>
      tpu.vector_store %arg4[%c0_206, %263, %c0_207], %266 {strides = array<i32>} : memref<1x64x32xf32, #tpu.memory_space<vmem>>, vector<1x8x32xf32>,
      %cst_208 = arith.constant dense<0.000000e+00> : vector<32xf32>
      %267 = vector.multi_reduction <add>, %260, %cst_208 [0] : vector<8x32xf32> to vector<32xf32>
      %268 = vector.shape_cast %267 : vector<32xf32> to vector<1x32xf32>
      %269 = arith.mulf %260, %260 : vector<8x32xf32>
      %cst_209 = arith.constant dense<0.000000e+00> : vector<32xf32>
      %270 = vector.multi_reduction <add>, %269, %cst_209 [0] : vector<8x32xf32> to vector<32xf32>
      %271 = vector.shape_cast %270 : vector<32xf32> to vector<1x32xf32>
      %c0_210 = arith.constant 0 : index
      %c0_211 = arith.constant 0 : index
      %c0_212 = arith.constant 0 : index
      %272 = vector.load %arg5[%c0_210, %c0_211, %c0_212] : memref<1x2x32xf32, #tpu.memory_space<vmem>>, vector<1x2x32xf32>
      %273 = vector.shape_cast %272 : vector<1x2x32xf32> to vector<2x32xf32>
      %274 = tpu.concatenate %268, %271 in 0 : vector<1x32xf32>, vector<1x32xf32> -> vector<2x32xf32>
      %275 = arith.addf %273, %274 : vector<2x32xf32>
      %c0_213 = arith.constant 0 : index
      %c0_214 = arith.constant 0 : index
      %c0_215 = arith.constant 0 : index
      %276 = vector.load %arg5[%c0_213, %c0_214, %c0_215] : memref<1x2x32xf32, #tpu.memory_space<vmem>>, vector<1x2x32xf32>
      %277 = vector.shape_cast %276 : vector<1x2x32xf32> to vector<2x32xf32>
      %278 = vector.shape_cast %275 : vector<2x32xf32> to vector<1x2x32xf32>
      tpu.vector_store %arg5[%c0_213, %c0_214, %c0_215], %278 {strides = array<i32>} : memref<1x2x32xf32, #tpu.memory_space<vmem>>, vector<1x2x32xf32>,
    }
    %c8_i32_2 = arith.constant 8 : i32
    return
  }
  func.func @transform_0(%arg0: i32) -> (i32, i32, i32) {
    %c0_i32 = arith.constant 0 : i32
    %c0_i32_0 = arith.constant 0 : i32
    %c0_i32_1 = arith.constant 0 : i32
    return %arg0, %c0_i32, %c0_i32_0 : i32, i32, i32
  }
  func.func @transform_1(%arg0: i32) -> (i32, i32, i32) {
    %c0_i32 = arith.constant 0 : i32
    %c0_i32_0 = arith.constant 0 : i32
    %c0_i32_1 = arith.constant 0 : i32
    %c0_i32_2 = arith.constant 0 : i32
    return %c0_i32, %c0_i32_0, %c0_i32_1 : i32, i32, i32
  }
  func.func @transform_2(%arg0: i32) -> (i32, i32) {
    %c0_i32 = arith.constant 0 : i32
    %c0_i32_0 = arith.constant 0 : i32
    %c0_i32_1 = arith.constant 0 : i32
    return %c0_i32, %c0_i32_0 : i32, i32
  }
  func.func @transform_3(%arg0: i32) -> (i32, i32, i32) {
    %c0_i32 = arith.constant 0 : i32
    %c0_i32_0 = arith.constant 0 : i32
    %c0_i32_1 = arith.constant 0 : i32
    return %arg0, %c0_i32, %c0_i32_0 : i32, i32, i32
  }
  func.func @transform_4(%arg0: i32) -> (i32, i32, i32) {
    %c0_i32 = arith.constant 0 : i32
    %c0_i32_0 = arith.constant 0 : i32
    %c0_i32_1 = arith.constant 0 : i32
    return %arg0, %c0_i32, %c0_i32_0 : i32, i32, i32
  }
}

</mosaic_0001>

<bundles_post_ra>
// kernel: tpu_custom_call.1
= control target key start
LH: loop header
LB: loop body
LE: loop exit
PB: predicated region body
PF: predicated region fallthrough
CT: control target
= control target key end

     0   :  { %10 = vsyncpa [#allocation3], 0  ;;  %s4430_s0 = inlined_call_operand.vmem [shape: f32[2,144,48], index: 0, kind: input, shape index: {}]   ;;  %s4431_s1 = inlined_call_operand.vmem [shape: f32[25,48,32], index: 1, kind: input, shape index: {}]   ;;  %s4432_s2 = inlined_call_operand.vmem [shape: f32[1,32], index: 2, kind: input, shape index: {}]   ;;  %s4433_s3 = inlined_call_operand.vmem [shape: f32[2,64,32], index: 3, kind: output, shape index: {0}]   ;;  %s4434_s4 = inlined_call_operand.hbm [shape: f32[2,2,32], index: 4, kind: output, shape index: {1}]  }
   0x1   :  { %12 = vsyncpa [#allocation3 + $0x1], 0  ;;  %s3675_s15 = smov 0   ;;  %s3677_s16 = smov 0  }
   0x2   :  { %s3679_s17 = smov 0   ;;  %s3681_s18 = smov 0  }
   0x3 LB: > { %s3696_s19 = sadd.s32 4294967295, %s3639_s18   ;;  %s2538_s20 = sadd.s32 4294967294, %s3639_s18   ;;  %s3639_s18 = sphi %s3681_s18, %s4440_s18   ;;  %s3635_s17 = sphi %s3679_s17, %s4439_s17   ;;  %s3631_s16 = sphi %s3677_s16, %s4438_s16   ;;  %s3627_s15 = sphi %s3675_s15, %s4437_s15  }
   0x4   : > { %s3700_s21 = sadd.s32 1, %s3639_s18   ;;  %s119_s22 = sadd.s32 1, %s3635_s17 }
   0x5   : > { %s116_s23 = ssub.s32 %s3639_s18, %s3700_s21  ;;  %p129_p0 = scmp.ne.s32.totalorder %s3635_s17, %s3631_s16 }
   0x6   : > { %p117_p1 = scmp.eq.s32.totalorder %s116_s23, 0  ;;  %p130_p2 = scmp.eq.s32.totalorder %s3696_s19, 1 }
   0x7   : > { %p135_p3 = scmp.ne.s32.totalorder %s3631_s16, %s3627_s15  ;;  %p136_p4 = scmp.eq.s32.totalorder %s2538_s20, 1 }
   0x8   : > { %s3711_s24 = scalar_select %p117_p1, %s3635_s17, %s119_s22  }
   0x9   : > { %p3713_p5 = por %p130_p2, %p129_p0  ;;  %p3717_p6 = por %p136_p4, %p135_p3 }
   0xa   : > { %p2541_p7 = scmp.ge.s32.totalorder %s3639_s18, 1  ;;  %p168_p8 = scmp.lt.s32.totalorder %s3639_s18, 3 }
   0xc   : > { %p169_p9 = pnand %p2541_p7, %p168_p8 }
   0xd   : > { %s196_s27 = sand.u32 (!%p169_p9), 1, %s3631_s16   ;;  %p199_p10 = scmp.lt.s32.totalorder (!%p169_p9), %s3696_s19, 1  ;;  %vm209_vm0 = vcmask (!%p169_p9), 254976   ;;  %v3645_v0 = vmov (!%p169_p9), 0.0  }
   0xe   : > { %172 = sbr.rel (%p169_p9) target bundleno = 432 (0x1b0), region = 32  ;;  %s2542_s28 = sshll.u32 (!%p169_p9), %s196_s27, 1 }
   0xf   : > { %s3728_s30 = scalar_lea.vmem (!%p169_p9), [#allocation2], %s2542_s28  ;;  %s3742_s13 = smov (!%p169_p9), 0  }
  0x10   : > { %210 = vst.msk [vmem:[%s3728_s30] sm:$0x3] (!%p169_p9), %vm209_vm0, %v3645_v0 }
  0x15   : > { %s200_s29 = scalar_select %p199_p10, %s3696_s19, 1 }
  0x17   : > { %s3521_s5 = smul.u32 144, %s200_s29  ;;  %s2745_s6 = sshll.u32 %s200_s29, 6 }
  0x18   : > { %s3735_s9 = scalar_lea.vmem %s4433_s3, %s2745_s6 }
  0x19   : > { %s3740_s12 = scalar_lea.vmem %s4430_s0, %s3521_s5 }
  0x1a LB: >> { %v2547_v1 = vld [vmem:[%s4431_s1 + $0x30] sm:$0xff]  ;;  %v2548_v2 = vld [vmem:[%s4431_s1 + $0x38] sm:$0xff]  ;;  %v220_v3 = vld [vmem:[%s4431_s1] sm:$0xff]  ;;  %v3646_v4 = vmov 0.0|0.0   ;;  %vm3647_vm1 = vmmov 0   ;;  %v3648_v12 = vmov 0.0   ;;  %s3643_s13 = sphi %s3742_s13, %s216_s13  }
  0x1b   : >> { %3296 = vmatprep.subr.bf16.mxu0 %v3646_v4  ;;  %v3297_v5 = vpack.c.bf16 %v2548_v2, %v2547_v1  ;;  %3305 = vmatprep.subr.bf16.mxu1 %v3646_v4  ;;  %v221_v6 = vld [vmem:[%s4431_s1 + $0x8] sm:$0xff]  ;;  %v2549_v7 = vld [vmem:[%s4431_s1 + $0x40] sm:$0xff]  ;;  %v222_v10 = vld [vmem:[%s4431_s1 + $0x10] sm:$0xff]  ;;  %s217_s7 = smul.u32 12, %s3643_s13  ;;  %vm236_vm2 = vcmask 392192   ;;  %vm2329_vm3 = vcmask 261120  }
  0x1c   : >> { %v2550_v8 = vld [vmem:[%s4431_s1 + $0x48] sm:$0xff]  ;;  %v3306_v9 = vpack.c.bf16 %v221_v6, %v220_v3  ;;  %v223_v11 = vld [vmem:[%s4431_s1 + $0x18] sm:$0xff]  ;;  %2933 = vmatprep.mubr.msk.f32.mxu0 %vm3647_vm1, %v3648_v12  ;;  %2948 = vmatprep.mubr.msk.f32.mxu1 %vm3647_vm1, %v3648_v12  ;;  %v2551_v15 = vld [vmem:[%s4431_s1 + $0x50] sm:$0xff]  ;;  %vm2347_vm4 = vcmask 1040384  }
  0x1d   : >> { %3298 = vmatpush3.bf16.msra.mxu0 %v3297_v5  ;;  %v3300_v13 = vpack.c.bf16 %v2550_v8, %v2549_v7  ;;  %v3309_v14 = vpack.c.bf16 %v223_v11, %v222_v10  ;;  %v2552_v16 = vld [vmem:[%s4431_s1 + $0x58] sm:$0xff]  ;;  %v224_v17 = vld [vmem:[%s4431_s1 + $0x20] sm:$0xff]  ;;  %v225_v18 = vld [vmem:[%s4431_s1 + $0x28] sm:$0xff]  ;;  %s3794_s20 = scalar_lea.vmem %s3740_s12, %s217_s7 }
  0x1e   : >> { %3307 = vmatpush3.bf16.msra.mxu1 %v3306_v9  ;;  %3299 = vmatprep.subr.bf16.mxu0 %v3646_v4  ;;  %v3303_v19 = vpack.c.bf16 %v2552_v16, %v2551_v15  ;;  %v3312_v20 = vpack.c.bf16 %v225_v18, %v224_v17  ;;  %v2556_v21 = vld [vmem:[%s4431_s1 + $0x60] sm:$0xff]  ;;  %v2557_v22 = vld [vmem:[%s4431_s1 + $0x68] sm:$0xff]  ;;  %v2564_v23 = vld [vmem:[%s4431_s1 + $0x90] sm:$0xff] }
  0x1f   : >> { %3308 = vmatprep.subr.bf16.mxu1 %v3646_v4  ;;  %v2565_v24 = vld [vmem:[%s4431_s1 + $0x98] sm:$0xff]  ;;  %v2546_v25 = vld [vmem:[%s3794_s20 + $0x1] sm:$0xff]  ;;  %v3315_v26 = vpack.c.bf16 %v2557_v22, %v2556_v21  ;;  %v2558_v29 = vld [vmem:[%s4431_s1 + $0x70] sm:$0xff] }
  0x20   : >> { %v219_v27 = vld [vmem:[%s3794_s20] sm:$0xff]  ;;  %v3324_v28 = vpack.c.bf16 %v2565_v24, %v2564_v23  ;;  %v2559_v30 = vld [vmem:[%s4431_s1 + $0x78] sm:$0xff]  ;;  %v2567_v32 = vld [vmem:[%s4431_s1 + $0xa8] sm:$0xff] }
  0x21   : >> { %3301 = vmatpush3.bf16.msra.mxu0 %v3300_v13  ;;  %v2566_v31 = vld [vmem:[%s4431_s1 + $0xa0] sm:$0xff]  ;;  %v3318_v33 = vpack.c.bf16 %v2559_v30, %v2558_v29  ;;  %v2561_v36 = vld [vmem:[%s4431_s1 + $0x88] sm:$0xff]  ;;  %v2568_v37 = vld [vmem:[%s4431_s1 + $0xb0] sm:$0xff] }
  0x22   : >> { %3310 = vmatpush3.bf16.msra.mxu1 %v3309_v14  ;;  %3302 = vmatprep.subr.bf16.mxu0 %v3646_v4  ;;  %v3327_v34 = vpack.c.bf16 %v2567_v32, %v2566_v31  ;;  %v2560_v35 = vld [vmem:[%s4431_s1 + $0x80] sm:$0xff]  ;;  %v2569_v38 = vld [vmem:[%s4431_s1 + $0xb8] sm:$0xff]  ;;  %v2573_v42 = vld [vmem:[%s4431_s1 + $0xc8] sm:$0xff] }
  0x23   : >> { %3311 = vmatprep.subr.bf16.mxu1 %v3646_v4  ;;  %v3321_v39 = vpack.c.bf16 %v2561_v36, %v2560_v35  ;;  %v3330_v40 = vpack.c.bf16 %v2569_v38, %v2568_v37  ;;  %v2572_v41 = vld [vmem:[%s4431_s1 + $0xc0] sm:$0xff]  ;;  %v2580_v43 = vld [vmem:[%s4431_s1 + $0xf0] sm:$0xff]  ;;  %v2581_v44 = vld [vmem:[%s4431_s1 + $0xf8] sm:$0xff] }
  0x24   : >> { %v2555_v45 = vld [vmem:[%s3794_s20 + $0x2] sm:$0xff]  ;;  %v3333_v46 = vpack.c.bf16 %v2573_v42, %v2572_v41  ;;  %v3342_v48 = vpack.c.bf16 %v2581_v44, %v2580_v43  ;;  %v2574_v49 = vld [vmem:[%s4431_s1 + $0xd0] sm:$0xff]  ;;  %v2575_v50 = vld [vmem:[%s4431_s1 + $0xd8] sm:$0xff] }
  0x25   : >> { %3304 = vmatpush3.bf16.msra.mxu0 %v3303_v19  ;;  %v2563_v47 = vld [vmem:[%s3794_s20 + $0x3] sm:$0xff]  ;;  %v3336_v53 = vpack.c.bf16 %v2575_v50, %v2574_v49  ;;  %v2584_v57 = vld [vmem:[%s4431_s1 + $0x110] sm:$0xff]  ;;  %v2585_v58 = vld [vmem:[%s4431_s1 + $0x118] sm:$0xff] }
  0x26   : >> { %3313 = vmatpush3.bf16.msra.mxu1 %v3312_v20  ;;  %3314 = vmatprep.subr.bf16.mxu0 %v3646_v4  ;;  %v2582_v51 = vld [vmem:[%s4431_s1 + $0x100] sm:$0xff]  ;;  %v2583_v52 = vld [vmem:[%s4431_s1 + $0x108] sm:$0xff]  ;;  %v3348_v60 = vpack.c.bf16 %v2585_v58, %v2584_v57  ;;  %v2596_v63 = vld [vmem:[%s4431_s1 + $0x150] sm:$0xff] }
  0x27   : >> { %3323 = vmatprep.subr.bf16.mxu1 %v3646_v4  ;;  %v3345_v54 = vpack.c.bf16 %v2583_v52, %v2582_v51  ;;  %v2576_v55 = vld [vmem:[%s4431_s1 + $0xe0] sm:$0xff]  ;;  %v2577_v56 = vld [vmem:[%s4431_s1 + $0xe8] sm:$0xff]  ;;  %v2597_v0 = vld [vmem:[%s4431_s1 + $0x158] sm:$0xff] }
  0x28   : >> { %2934 = vmatmul.mubr.msk.f32.vlgmr.msra.gmra.mrb[0].mxu0 %vm236_vm2, %v2546_v25  ;;  %v3339_v59 = vpack.c.bf16 %v2577_v56, %v2576_v55  ;;  %v2588_v61 = vld [vmem:[%s4431_s1 + $0x120] sm:$0xff]  ;;  %v2589_v62 = vld [vmem:[%s4431_s1 + $0x128] sm:$0xff]  ;;  %v3360_v5 = vpack.c.bf16 %v2597_v0, %v2596_v63  ;;  %v2590_v6 = vld [vmem:[%s4431_s1 + $0x130] sm:$0xff] }
  0x29   : >> { %2949 = vmatmul.mubr.msk.f32.vlgmr.msra.gmra.mrb[0].mxu1 %vm236_vm2, %v219_v27  ;;  %3316 = vmatpush3.bf16.msra.mxu0 %v3315_v26  ;;  %v2571_v1 = vld [vmem:[%s3794_s20 + $0x4] sm:$0xff]  ;;  %v3351_v2 = vpack.c.bf16 %v2589_v62, %v2588_v61  ;;  %v2579_v3 = vld [vmem:[%s3794_s20 + $0xc] sm:$0xff]  ;;  %v2591_v7 = vld [vmem:[%s4431_s1 + $0x138] sm:$0xff] }
  0x2a   : >> { %3325 = vmatpush3.bf16.msra.mxu1 %v3324_v28  ;;  %3317 = vmatprep.subr.bf16.mxu0 %v3646_v4  ;;  %v2598_v8 = vld [vmem:[%s4431_s1 + $0x160] sm:$0xff]  ;;  %v2599_v9 = vld [vmem:[%s4431_s1 + $0x168] sm:$0xff]  ;;  %v3354_v10 = vpack.c.bf16 %v2591_v7, %v2590_v6  ;;  %v2600_v15 = vld [vmem:[%s4431_s1 + $0x170] sm:$0xff] }
  0x2b   : >> { %3326 = vmatprep.subr.bf16.mxu1 %v3646_v4  ;;  %2963 = vmatprep.mubr.msk.f32.mxu0 %vm3647_vm1, %v3648_v12  ;;  %v3363_v11 = vpack.c.bf16 %v2599_v9, %v2598_v8  ;;  %v2592_v13 = vld [vmem:[%s4431_s1 + $0x140] sm:$0xff]  ;;  %v2593_v14 = vld [vmem:[%s4431_s1 + $0x148] sm:$0xff]  ;;  %v2601_v16 = vld [vmem:[%s4431_s1 + $0x178] sm:$0xff] }
  0x2c   : >> { %2978 = vmatprep.mubr.msk.f32.mxu1 %vm3647_vm1, %v3648_v12  ;;  %v3357_v17 = vpack.c.bf16 %v2593_v14, %v2592_v13  ;;  %v3366_v18 = vpack.c.bf16 %v2601_v16, %v2600_v15  ;;  %v2604_v19 = vld [vmem:[%s4431_s1 + $0x180] sm:$0xff]  ;;  %v2605_v20 = vld [vmem:[%s4431_s1 + $0x188] sm:$0xff]  ;;  %v2612_v21 = vld [vmem:[%s4431_s1 + $0x1b0] sm:$0xff] }
  0x2d   : >> { %3319 = vmatpush3.bf16.msra.mxu0 %v3318_v33  ;;  %v2613_v22 = vld [vmem:[%s4431_s1 + $0x1b8] sm:$0xff]  ;;  %v2587_v23 = vld [vmem:[%s3794_s20 + $0xd] sm:$0xff]  ;;  %v3369_v24 = vpack.c.bf16 %v2605_v20, %v2604_v19  ;;  %v2614_v29 = vld [vmem:[%s4431_s1 + $0x1c0] sm:$0xff] }
  0x2e   : >> { %3328 = vmatpush3.bf16.msra.mxu1 %v3327_v34  ;;  %3320 = vmatprep.subr.bf16.mxu0 %v3646_v4  ;;  %v2595_v25 = vld [vmem:[%s3794_s20 + $0xe] sm:$0xff]  ;;  %v3378_v26 = vpack.c.bf16 %v2613_v22, %v2612_v21  ;;  %v2607_v28 = vld [vmem:[%s4431_s1 + $0x198] sm:$0xff]  ;;  %v2608_v33 = vld [vmem:[%s4431_s1 + $0x1a0] sm:$0xff] }
  0x2f   : >> { %3329 = vmatprep.subr.bf16.mxu1 %v3646_v4  ;;  %v2606_v27 = vld [vmem:[%s4431_s1 + $0x190] sm:$0xff]  ;;  %v2615_v30 = vld [vmem:[%s4431_s1 + $0x1c8] sm:$0xff]  ;;  %v2617_v36 = vld [vmem:[%s4431_s1 + $0x1d8] sm:$0xff] }
  0x30   : >> { %v3372_v31 = vpack.c.bf16 %v2607_v28, %v2606_v27  ;;  %v3381_v32 = vpack.c.bf16 %v2615_v30, %v2614_v29  ;;  %v2609_v34 = vld [vmem:[%s4431_s1 + $0x1a8] sm:$0xff]  ;;  %v2616_v35 = vld [vmem:[%s4431_s1 + $0x1d0] sm:$0xff]  ;;  %v2629_v42 = vld [vmem:[%s4431_s1 + $0x218] sm:$0xff] }
  0x31   : >> { %3322 = vmatpush3.bf16.msra.mxu0 %v3321_v39  ;;  %v3375_v37 = vpack.c.bf16 %v2609_v34, %v2608_v33  ;;  %v3384_v38 = vpack.c.bf16 %v2617_v36, %v2616_v35  ;;  %v2620_v39 = vld [vmem:[%s4431_s1 + $0x1e0] sm:$0xff]  ;;  %v2628_v41 = vld [vmem:[%s4431_s1 + $0x210] sm:$0xff]  ;;  %v2631_v50 = vld [vmem:[%s4431_s1 + $0x228] sm:$0xff] }
  0x32   : >> { %3331 = vmatpush3.bf16.msra.mxu1 %v3330_v40  ;;  %3332 = vmatprep.subr.bf16.mxu0 %v3646_v4  ;;  %v2621_v40 = vld [vmem:[%s4431_s1 + $0x1e8] sm:$0xff]  ;;  %v2630_v49 = vld [vmem:[%s4431_s1 + $0x220] sm:$0xff]  ;;  %v2632_v55 = vld [vmem:[%s4431_s1 + $0x230] sm:$0xff] }
  0x33   : >> { %3341 = vmatprep.subr.bf16.mxu1 %v3646_v4  ;;  %v2603_v43 = vld [vmem:[%s3794_s20 + $0xf] sm:$0xff]  ;;  %v3387_v44 = vpack.c.bf16 %v2621_v40, %v2620_v39  ;;  %v3399_v52 = vpack.c.bf16 %v2631_v50, %v2630_v49  ;;  %v2633_v56 = vld [vmem:[%s4431_s1 + $0x238] sm:$0xff]  ;;  %v2646_v6 = vld [vmem:[%s4431_s1 + $0x280] sm:$0xff] }
  0x34   : >> { %2964 = vmatmul.mubr.msk.f32.vlgmr.msra.gmra.mrb[2].mxu0 %vm236_vm2, %v2555_v45  ;;  %v2611_v45 = vld [vmem:[%s3794_s20 + $0x10] sm:$0xff]  ;;  %v3402_v58 = vpack.c.bf16 %v2633_v56, %v2632_v55  ;;  %v2645_v62 = vld [vmem:[%s4431_s1 + $0x278] sm:$0xff]  ;;  %v2647_v7 = vld [vmem:[%s4431_s1 + $0x288] sm:$0xff] }
  0x35   : >> { %3334 = vmatpush3.bf16.msra.mxu0 %v3333_v46  ;;  %2979 = vmatmul.mubr.msk.f32.vlgmr.msra.gmra.mrb[2].mxu1 %vm236_vm2, %v2563_v47  ;;  %v3396_v46 = vpack.c.bf16 %v2629_v42, %v2628_v41  ;;  %v2622_v47 = vld [vmem:[%s4431_s1 + $0x1f0] sm:$0xff]  ;;  %v2619_v63 = vld [vmem:[%s3794_s20 + $0x18] sm:$0xff]  ;;  %v3417_v9 = vpack.c.bf16 %v2647_v7, %v2646_v6  ;;  %v2662_v27 = vld [vmem:[%s4431_s1 + $0x2e0] sm:$0xff] }
  0x36   : >> { %3343 = vmatpush3.bf16.msra.mxu1 %v3342_v48  ;;  %3335 = vmatprep.subr.bf16.mxu0 %v3646_v4  ;;  %v2623_v48 = vld [vmem:[%s4431_s1 + $0x1f8] sm:$0xff]  ;;  %v2644_v61 = vld [vmem:[%s4431_s1 + $0x270] sm:$0xff]  ;;  %v2663_v28 = vld [vmem:[%s4431_s1 + $0x2e8] sm:$0xff] }
  0x37   : >> { %3344 = vmatprep.subr.bf16.mxu1 %v3646_v4  ;;  %2993 = vmatprep.mubr.msk.f32.mxu0 %vm3647_vm1, %v3648_v12  ;;  %v3390_v51 = vpack.c.bf16 %v2623_v48, %v2622_v47  ;;  %v2648_v13 = vld [vmem:[%s4431_s1 + $0x290] sm:$0xff]  ;;  %v2649_v14 = vld [vmem:[%s4431_s1 + $0x298] sm:$0xff]  ;;  %v3435_v30 = vpack.c.bf16 %v2663_v28, %v2662_v27  ;;  %v2678_v47 = vld [vmem:[%s4431_s1 + $0x340] sm:$0xff] }
  0x38   : >> { %3008 = vmatprep.mubr.msk.f32.mxu1 %vm3647_vm1, %v3648_v12  ;;  %v3420_v16 = vpack.c.bf16 %v2649_v14, %v2648_v13  ;;  %v2660_v19 = vld [vmem:[%s4431_s1 + $0x2d0] sm:$0xff]  ;;  %v2661_v20 = vld [vmem:[%s4431_s1 + $0x2d8] sm:$0xff]  ;;  %v2679_v48 = vld [vmem:[%s4431_s1 + $0x348] sm:$0xff] }
  0x39   : >> { %3337 = vmatpush3.bf16.msra.mxu0 %v3336_v53  ;;  %v2624_v53 = vld [vmem:[%s4431_s1 + $0x200] sm:$0xff]  ;;  %v2664_v33 = vld [vmem:[%s4431_s1 + $0x2f0] sm:$0xff]  ;;  %v2665_v34 = vld [vmem:[%s4431_s1 + $0x2f8] sm:$0xff]  ;;  %v3453_v50 = vpack.c.bf16 %v2679_v48, %v2678_v47 }
  0x3a   : >> { %3346 = vmatpush3.bf16.msra.mxu1 %v3345_v54  ;;  %3338 = vmatprep.subr.bf16.mxu0 %v3646_v4  ;;  %v2625_v54 = vld [vmem:[%s4431_s1 + $0x208] sm:$0xff]  ;;  %v2635_v21 = vld [vmem:[%s3794_s20 + $0x1a] sm:$0xff]  ;;  %v3438_v36 = vpack.c.bf16 %v2665_v34, %v2664_v33  ;;  %v2676_v39 = vld [vmem:[%s4431_s1 + $0x330] sm:$0xff] }
  0x3b   : >> { %3347 = vmatprep.subr.bf16.mxu1 %v3646_v4  ;;  %v3393_v57 = vpack.c.bf16 %v2625_v54, %v2624_v53  ;;  %v2677_v40 = vld [vmem:[%s4431_s1 + $0x338] sm:$0xff]  ;;  %v2680_v53 = vld [vmem:[%s4431_s1 + $0x350] sm:$0xff] }
  0x3c   : >> { %v2651_v41 = vld [vmem:[%s3794_s20 + $0x1c] sm:$0xff] }
  0x3d   : >> { %3340 = vmatpush3.bf16.msra.mxu0 %v3339_v59  ;;  %v2636_v59 = vld [vmem:[%s4431_s1 + $0x240] sm:$0xff]  ;;  %v2681_v54 = vld [vmem:[%s4431_s1 + $0x358] sm:$0xff] }
  0x3e   : >> { %3349 = vmatpush3.bf16.msra.mxu1 %v3348_v60  ;;  %3350 = vmatprep.subr.bf16.mxu0 %v3646_v4  ;;  %v2637_v60 = vld [vmem:[%s4431_s1 + $0x248] sm:$0xff]  ;;  %v3456_v56 = vpack.c.bf16 %v2681_v54, %v2680_v53 }
  0x3f   : >> { %3359 = vmatprep.subr.bf16.mxu1 %v3646_v4  ;;  %v3405_v0 = vpack.c.bf16 %v2637_v60, %v2636_v59  ;;  %v2692_v59 = vld [vmem:[%s4431_s1 + $0x390] sm:$0xff]  ;;  %v2693_v60 = vld [vmem:[%s4431_s1 + $0x398] sm:$0xff] }
  0x40   : >> { %2994 = vmatmul.mubr.msk.f32.vlgmr.msra.gmra.mrb[4].mxu0 %vm236_vm2, %v2571_v1  ;;  %v2627_v1 = vld [vmem:[%s3794_s20 + $0x19] sm:$0xff] }
  0x41   : >> { %3352 = vmatpush3.bf16.msra.mxu0 %v3351_v2  ;;  %3009 = vmatmul.mubr.msk.f32.vlgmr.msra.gmra.mrb[4].mxu1 %vm236_vm2, %v2579_v3  ;;  %v3414_v2 = vpack.c.bf16 %v2645_v62, %v2644_v61  ;;  %v2638_v3 = vld [vmem:[%s4431_s1 + $0x250] sm:$0xff]  ;;  %v2667_v61 = vld [vmem:[%s3794_s20 + $0x25] sm:$0xff] }
  0x42   : >> { %3361 = vmatpush3.bf16.msra.mxu1 %v3360_v5  ;;  %3353 = vmatprep.subr.bf16.mxu0 %v3646_v4  ;;  %v2639_v5 = vld [vmem:[%s4431_s1 + $0x258] sm:$0xff] }
  0x43   : >> { %3362 = vmatprep.subr.bf16.mxu1 %v3646_v4  ;;  %3023 = vmatprep.mubr.msk.f32.mxu0 %vm3647_vm1, %v3648_v12  ;;  %v3408_v8 = vpack.c.bf16 %v2639_v5, %v2638_v3  ;;  %v2694_v3 = vld [vmem:[%s4431_s1 + $0x3a0] sm:$0xff]  ;;  %v2695_v5 = vld [vmem:[%s4431_s1 + $0x3a8] sm:$0xff] }
  0x44   : >> { %3038 = vmatprep.mubr.msk.f32.mxu1 %vm3647_vm1, %v3648_v12  ;;  %v3471_v7 = vpack.c.bf16 %v2695_v5, %v2694_v3 }
  0x45   : >> { %3355 = vmatpush3.bf16.msra.mxu0 %v3354_v10  ;;  %v2640_v10 = vld [vmem:[%s4431_s1 + $0x260] sm:$0xff] }
  0x46   : >> { %3364 = vmatpush3.bf16.msra.mxu1 %v3363_v11  ;;  %3356 = vmatprep.subr.bf16.mxu0 %v3646_v4  ;;  %v2641_v11 = vld [vmem:[%s4431_s1 + $0x268] sm:$0xff] }
  0x47   : >> { %3365 = vmatprep.subr.bf16.mxu1 %v3646_v4  ;;  %v3411_v15 = vpack.c.bf16 %v2641_v11, %v2640_v10  ;;  %v2696_v10 = vld [vmem:[%s4431_s1 + $0x3b0] sm:$0xff]  ;;  %v2697_v11 = vld [vmem:[%s4431_s1 + $0x3b8] sm:$0xff] }
  0x48   : >> { %v3474_v14 = vpack.c.bf16 %v2697_v11, %v2696_v10 }
  0x49   : >> { %3358 = vmatpush3.bf16.msra.mxu0 %v3357_v17  ;;  %v2652_v17 = vld [vmem:[%s4431_s1 + $0x2a0] sm:$0xff] }
  0x4a   : >> { %3367 = vmatpush3.bf16.msra.mxu1 %v3366_v18  ;;  %3368 = vmatprep.subr.bf16.mxu0 %v3646_v4  ;;  %v2653_v18 = vld [vmem:[%s4431_s1 + $0x2a8] sm:$0xff] }
  0x4b   : >> { %3377 = vmatprep.subr.bf16.mxu1 %v3646_v4  ;;  %v3423_v22 = vpack.c.bf16 %v2653_v18, %v2652_v17  ;;  %v2708_v17 = vld [vmem:[%s4431_s1 + $0x3f0] sm:$0xff]  ;;  %v2709_v18 = vld [vmem:[%s4431_s1 + $0x3f8] sm:$0xff] }
  0x4c   : >> { %3024 = vmatmul.mubr.msk.f32.vlgmr.msra.gmra.mrb[6].mxu0 %vm236_vm2, %v2587_v23  ;;  %v2643_v23 = vld [vmem:[%s3794_s20 + $0x1b] sm:$0xff] }
  0x4d   : >> { %3370 = vmatpush3.bf16.msra.mxu0 %v3369_v24  ;;  %3039 = vmatmul.mubr.msk.f32.vlgmr.msra.gmra.mrb[6].mxu1 %vm236_vm2, %v2595_v25  ;;  %v3432_v24 = vpack.c.bf16 %v2661_v20, %v2660_v19  ;;  %v2654_v25 = vld [vmem:[%s4431_s1 + $0x2b0] sm:$0xff]  ;;  %v2683_v19 = vld [vmem:[%s3794_s20 + $0x27] sm:$0xff] }
  0x4e   : >> { %3379 = vmatpush3.bf16.msra.mxu1 %v3378_v26  ;;  %3371 = vmatprep.subr.bf16.mxu0 %v3646_v4  ;;  %v2655_v26 = vld [vmem:[%s4431_s1 + $0x2b8] sm:$0xff] }
  0x4f   : >> { %3380 = vmatprep.subr.bf16.mxu1 %v3646_v4  ;;  %3053 = vmatprep.mubr.msk.f32.mxu0 %vm3647_vm1, %v3648_v12  ;;  %v3426_v29 = vpack.c.bf16 %v2655_v26, %v2654_v25  ;;  %v2710_v25 = vld [vmem:[%s4431_s1 + $0x400] sm:$0xff]  ;;  %v2711_v26 = vld [vmem:[%s4431_s1 + $0x408] sm:$0xff] }
  0x50   : >> { %3068 = vmatprep.mubr.msk.f32.mxu1 %vm3647_vm1, %v3648_v12  ;;  %v3489_v28 = vpack.c.bf16 %v2711_v26, %v2710_v25 }
  0x51   : >> { %3373 = vmatpush3.bf16.msra.mxu0 %v3372_v31  ;;  %v2656_v31 = vld [vmem:[%s4431_s1 + $0x2c0] sm:$0xff] }
  0x52   : >> { %3382 = vmatpush3.bf16.msra.mxu1 %v3381_v32  ;;  %3374 = vmatprep.subr.bf16.mxu0 %v3646_v4  ;;  %v2657_v32 = vld [vmem:[%s4431_s1 + $0x2c8] sm:$0xff] }
  0x53   : >> { %3383 = vmatprep.subr.bf16.mxu1 %v3646_v4  ;;  %v3429_v35 = vpack.c.bf16 %v2657_v32, %v2656_v31  ;;  %v2712_v31 = vld [vmem:[%s4431_s1 + $0x410] sm:$0xff]  ;;  %v2713_v32 = vld [vmem:[%s4431_s1 + $0x418] sm:$0xff] }
  0x54   : >> { %v3492_v34 = vpack.c.bf16 %v2713_v32, %v2712_v31 }
  0x55   : >> { %3376 = vmatpush3.bf16.msra.mxu0 %v3375_v37  ;;  %v2668_v37 = vld [vmem:[%s4431_s1 + $0x300] sm:$0xff] }
  0x56   : >> { %3385 = vmatpush3.bf16.msra.mxu1 %v3384_v38  ;;  %3386 = vmatprep.subr.bf16.mxu0 %v3646_v4  ;;  %v2669_v38 = vld [vmem:[%s4431_s1 + $0x308] sm:$0xff] }
  0x57   : >> { %3395 = vmatprep.subr.bf16.mxu1 %v3646_v4  ;;  %v3441_v42 = vpack.c.bf16 %v2669_v38, %v2668_v37  ;;  %v2724_v37 = vld [vmem:[%s4431_s1 + $0x450] sm:$0xff]  ;;  %v2725_v38 = vld [vmem:[%s4431_s1 + $0x458] sm:$0xff] }
  0x58   : >> { %3054 = vmatmul.mubr.msk.f32.vlgmr.msra.gmra.mrb[8].mxu0 %vm236_vm2, %v2603_v43  ;;  %v2659_v43 = vld [vmem:[%s3794_s20 + $0x24] sm:$0xff] }
  0x59   : >> { %3388 = vmatpush3.bf16.msra.mxu0 %v3387_v44  ;;  %3069 = vmatmul.mubr.msk.f32.vlgmr.msra.gmra.mrb[8].mxu1 %vm236_vm2, %v2611_v45  ;;  %v3450_v44 = vpack.c.bf16 %v2677_v40, %v2676_v39  ;;  %v2670_v45 = vld [vmem:[%s4431_s1 + $0x310] sm:$0xff] }
  0x5a   : >> { %3397 = vmatpush3.bf16.msra.mxu1 %v3396_v46  ;;  %3389 = vmatprep.subr.bf16.mxu0 %v3646_v4  ;;  %v2671_v46 = vld [vmem:[%s4431_s1 + $0x318] sm:$0xff]  ;;  %v2699_v39 = vld [vmem:[%s3794_s20 + $0x30] sm:$0xff] }
  0x5b   : >> { %3398 = vmatprep.subr.bf16.mxu1 %v3646_v4  ;;  %3083 = vmatprep.mubr.msk.f32.mxu0 %vm3647_vm1, %v3648_v12  ;;  %v3444_v49 = vpack.c.bf16 %v2671_v46, %v2670_v45  ;;  %v2726_v45 = vld [vmem:[%s4431_s1 + $0x460] sm:$0xff]  ;;  %v2727_v46 = vld [vmem:[%s4431_s1 + $0x468] sm:$0xff] }
  0x5c   : >> { %3098 = vmatprep.mubr.msk.f32.mxu1 %vm3647_vm1, %v3648_v12  ;;  %v3507_v48 = vpack.c.bf16 %v2727_v46, %v2726_v45 }
  0x5d   : >> { %3391 = vmatpush3.bf16.msra.mxu0 %v3390_v51  ;;  %v2672_v51 = vld [vmem:[%s4431_s1 + $0x320] sm:$0xff] }
  0x5e   : >> { %3400 = vmatpush3.bf16.msra.mxu1 %v3399_v52  ;;  %3392 = vmatprep.subr.bf16.mxu0 %v3646_v4  ;;  %v2673_v52 = vld [vmem:[%s4431_s1 + $0x328] sm:$0xff] }
  0x5f   : >> { %3401 = vmatprep.subr.bf16.mxu1 %v3646_v4  ;;  %v3447_v55 = vpack.c.bf16 %v2673_v52, %v2672_v51  ;;  %v2728_v51 = vld [vmem:[%s4431_s1 + $0x470] sm:$0xff]  ;;  %v2729_v52 = vld [vmem:[%s4431_s1 + $0x478] sm:$0xff] }
  0x60   : >> { %v3510_v54 = vpack.c.bf16 %v2729_v52, %v2728_v51 }
  0x61   : >> { %3394 = vmatpush3.bf16.msra.mxu0 %v3393_v57  ;;  %v2684_v57 = vld [vmem:[%s4431_s1 + $0x360] sm:$0xff] }
  0x62   : >> { %3403 = vmatpush3.bf16.msra.mxu1 %v3402_v58  ;;  %3404 = vmatprep.subr.bf16.mxu0 %v3646_v4  ;;  %v2685_v58 = vld [vmem:[%s4431_s1 + $0x368] sm:$0xff] }
  0x63   : >> { %3413 = vmatprep.subr.bf16.mxu1 %v3646_v4  ;;  %v3459_v62 = vpack.c.bf16 %v2685_v58, %v2684_v57  ;;  %v2715_v57 = vld [vmem:[%s3794_s20 + $0x32] sm:$0xff] }
  0x64   : >> { %3084 = vmatmul.mubr.msk.f32.vlgmr.msra.gmra.mrb[10].mxu0 %vm236_vm2, %v2619_v63  ;;  %v2675_v63 = vld [vmem:[%s3794_s20 + $0x26] sm:$0xff] }
  0x65   : >> { %3406 = vmatpush3.bf16.msra.mxu0 %v3405_v0  ;;  %3099 = vmatmul.mubr.msk.f32.vlgmr.msra.gmra.mrb[10].mxu1 %vm236_vm2, %v2627_v1  ;;  %v3468_v0 = vpack.c.bf16 %v2693_v60, %v2692_v59  ;;  %v2686_v1 = vld [vmem:[%s4431_s1 + $0x370] sm:$0xff] }
  0x66   : >> { %3415 = vmatpush3.bf16.msra.mxu1 %v3414_v2  ;;  %3407 = vmatprep.subr.bf16.mxu0 %v3646_v4  ;;  %v2687_v2 = vld [vmem:[%s4431_s1 + $0x378] sm:$0xff]  ;;  %v2734_v60 = vld [vmem:[%s4431_s1 + $0x490] sm:$0xff] }
  0x67   : >> { %3416 = vmatprep.subr.bf16.mxu1 %v3646_v4  ;;  %3113 = vmatprep.mubr.msk.f32.mxu0 %vm3647_vm1, %v3648_v12  ;;  %v3462_v6 = vpack.c.bf16 %v2687_v2, %v2686_v1  ;;  %v2723_v59 = vld [vmem:[%s3794_s20 + $0x33] sm:$0xff] }
  0x68   : >> { %3128 = vmatprep.mubr.msk.f32.mxu1 %vm3647_vm1, %v3648_v12  ;;  %v2731_v2 = vld [vmem:[%s3794_s20 + $0x34] sm:$0xff] }
  0x69   : >> { %3409 = vmatpush3.bf16.msra.mxu0 %v3408_v8  ;;  %v2688_v8 = vld [vmem:[%s4431_s1 + $0x380] sm:$0xff] }
  0x6a   : >> { %3418 = vmatpush3.bf16.msra.mxu1 %v3417_v9  ;;  %3410 = vmatprep.subr.bf16.mxu0 %v3646_v4  ;;  %v2689_v9 = vld [vmem:[%s4431_s1 + $0x388] sm:$0xff] }
  0x6b   : >> { %3419 = vmatprep.subr.bf16.mxu1 %v3646_v4  ;;  %v3465_v13 = vpack.c.bf16 %v2689_v9, %v2688_v8 }
  0x6d   : >> { %3412 = vmatpush3.bf16.msra.mxu0 %v3411_v15  ;;  %v2700_v15 = vld [vmem:[%s4431_s1 + $0x3c0] sm:$0xff] }
  0x6e   : >> { %3421 = vmatpush3.bf16.msra.mxu1 %v3420_v16  ;;  %3422 = vmatprep.subr.bf16.mxu0 %v3646_v4  ;;  %v2701_v16 = vld [vmem:[%s4431_s1 + $0x3c8] sm:$0xff] }
  0x6f   : >> { %3431 = vmatprep.subr.bf16.mxu1 %v3646_v4  ;;  %v3477_v20 = vpack.c.bf16 %v2701_v16, %v2700_v15 }
  0x70   : >> { %3114 = vmatmul.mubr.msk.f32.vlgmr.msra.gmra.mrb[12].mxu0 %vm236_vm2, %v2635_v21  ;;  %v2691_v21 = vld [vmem:[%s3794_s20 + $0x28] sm:$0xff] }
  0x71   : >> { %3424 = vmatpush3.bf16.msra.mxu0 %v3423_v22  ;;  %3129 = vmatmul.mubr.msk.f32.vlgmr.msra.gmra.mrb[12].mxu1 %vm236_vm2, %v2643_v23  ;;  %v3486_v22 = vpack.c.bf16 %v2709_v18, %v2708_v17  ;;  %v2702_v23 = vld [vmem:[%s4431_s1 + $0x3d0] sm:$0xff] }
  0x72   : >> { %3433 = vmatpush3.bf16.msra.mxu1 %v3432_v24  ;;  %3425 = vmatprep.subr.bf16.mxu0 %v3646_v4  ;;  %v2703_v24 = vld [vmem:[%s4431_s1 + $0x3d8] sm:$0xff] }
  0x73   : >> { %3434 = vmatprep.subr.bf16.mxu1 %v3646_v4  ;;  %3143 = vmatprep.mubr.msk.f32.mxu0 %vm3647_vm1, %v3648_v12  ;;  %v3480_v27 = vpack.c.bf16 %v2703_v24, %v2702_v23 }
  0x74   : >> { %3158 = vmatprep.mubr.msk.f32.mxu1 %vm3647_vm1, %v3648_v12 }
  0x75   : >> { %3427 = vmatpush3.bf16.msra.mxu0 %v3426_v29  ;;  %v2704_v29 = vld [vmem:[%s4431_s1 + $0x3e0] sm:$0xff] }
  0x76   : >> { %3436 = vmatpush3.bf16.msra.mxu1 %v3435_v30  ;;  %3428 = vmatprep.subr.bf16.mxu0 %v3646_v4  ;;  %v2705_v30 = vld [vmem:[%s4431_s1 + $0x3e8] sm:$0xff] }
  0x77   : >> { %3437 = vmatprep.subr.bf16.mxu1 %v3646_v4  ;;  %v3483_v33 = vpack.c.bf16 %v2705_v30, %v2704_v29 }
  0x79   : >> { %3430 = vmatpush3.bf16.msra.mxu0 %v3429_v35  ;;  %v2716_v35 = vld [vmem:[%s4431_s1 + $0x420] sm:$0xff] }
  0x7a   : >> { %3439 = vmatpush3.bf16.msra.mxu1 %v3438_v36  ;;  %3440 = vmatprep.subr.bf16.mxu0 %v3646_v4  ;;  %v2717_v36 = vld [vmem:[%s4431_s1 + $0x428] sm:$0xff] }
  0x7b   : >> { %3449 = vmatprep.subr.bf16.mxu1 %v3646_v4  ;;  %v3495_v40 = vpack.c.bf16 %v2717_v36, %v2716_v35 }
  0x7c   : >> { %3144 = vmatmul.mubr.msk.f32.vlgmr.msra.gmra.mrb[14].mxu0 %vm236_vm2, %v2651_v41  ;;  %v2707_v41 = vld [vmem:[%s3794_s20 + $0x31] sm:$0xff]  ;;  %s2740_s20 = sshll.u32 %s3643_s13, 3  ;;  %s216_s13 = sadd.s32 1, %s3643_s13  }
  0x7d   : >> { %3442 = vmatpush3.bf16.msra.mxu0 %v3441_v42  ;;  %3159 = vmatmul.mubr.msk.f32.vlgmr.msra.gmra.mrb[14].mxu1 %vm236_vm2, %v2659_v43  ;;  %v3504_v42 = vpack.c.bf16 %v2725_v38, %v2724_v37  ;;  %v2718_v43 = vld [vmem:[%s4431_s1 + $0x430] sm:$0xff]  ;;  %s2328_s29 = scalar_lea.vmem %s3735_s9, %s2740_s20  ;;  %p213_p11 = scmp.ge.s32.totalorder %s216_s13, 8  }
  0x7e   : >> { %3451 = vmatpush3.bf16.msra.mxu1 %v3450_v44  ;;  %3443 = vmatprep.subr.bf16.mxu0 %v3646_v4  ;;  %v2719_v44 = vld [vmem:[%s4431_s1 + $0x438] sm:$0xff]  ;;  %s2742_s5 = sshll.u32 (%p213_p11), %s3696_s19, 5  ;;  %s2373_s7 = sshll.u32 (%p213_p11), %s3728_s30, 4  ;;  %s2374_s7 = int_to_ptr.vmem [resolvable:$true] %s2373_s7 }
  0x7f   : >> { %3452 = vmatprep.subr.bf16.mxu1 %v3646_v4  ;;  %3173 = vmatprep.mubr.msk.f32.mxu0 %vm3647_vm1, %v3648_v12  ;;  %v3498_v47 = vpack.c.bf16 %v2719_v44, %v2718_v43  ;;  %s4391_s10 = scalar_lea.hbm (%p213_p11), %s4434_s4, %s2742_s5  ;;  %s2357_s11 = scalar_lea.sflag (%p213_p11), [#allocation3], %s196_s27 }
  0x80   : >> { %3188 = vmatprep.mubr.msk.f32.mxu1 %vm3647_vm1, %v3648_v12  ;;  %s3573_s14 = scalar_lea.vmem (%p213_p11), %s2374_s7, 32  ;;  %s3649_s13 = smov (%p213_p11), [#allocation2]  }
  0x81   : >> { %3445 = vmatpush3.bf16.msra.mxu0 %v3444_v49  ;;  %v2720_v49 = vld [vmem:[%s4431_s1 + $0x440] sm:$0xff]  ;;  %p3574_p12 = scmp.ne.s32.totalorder (%p213_p11), %s2374_s7, %s3573_s14  ;;  %s3577_s9 = sshll.u32 (%p213_p11), %s3649_s13, 4  ;;  %s3578_s9 = int_to_ptr.vmem [resolvable:$false] %s3577_s9 }
  0x82   : >> { %3454 = vmatpush3.bf16.msra.mxu1 %v3453_v50  ;;  %3446 = vmatprep.subr.bf16.mxu0 %v3646_v4  ;;  %v2721_v50 = vld [vmem:[%s4431_s1 + $0x448] sm:$0xff]  ;;  %s3579_s12 = scalar_lea.vmem (%p213_p11), %s3578_s9, 64  ;;  %p3580_p1 = scmp.lt.s32.totalorder (%p213_p11), %s2374_s7, %s3578_s9 }
  0x83   : >> { %3455 = vmatprep.subr.bf16.mxu1 %v3646_v4  ;;  %v3501_v53 = vpack.c.bf16 %v2721_v50, %v2720_v49  ;;  %p3575_p13 = pnand (%p213_p11), %p3574_p12, %p3713_p5  ;;  %p3581_p2 = scmp.lt.s32.totalorder (%p213_p11), %s3579_s12, %s3573_s14 }
  0x85   : >> { %3448 = vmatpush3.bf16.msra.mxu0 %v3447_v55  ;;  %v2732_v55 = vld [vmem:[%s4431_s1 + $0x480] sm:$0xff]  ;;  %p3576_p0 = pneg (%p213_p11), %p3575_p13  ;;  %p3582_p3 = por (%p213_p11), %p3581_p2, %p3580_p1 }
  0x86   : >> { %3457 = vmatpush3.bf16.msra.mxu1 %v3456_v56  ;;  %3458 = vmatprep.subr.bf16.mxu0 %v3646_v4  ;;  %v2733_v56 = vld [vmem:[%s4431_s1 + $0x488] sm:$0xff] }
  0x87   : >> { %3467 = vmatprep.subr.bf16.mxu1 %v3646_v4  ;;  %v3513_v58 = vpack.c.bf16 %v2733_v56, %v2732_v55  ;;  %p3583_p4 = pnand (%p213_p11), %p3582_p3, %p3576_p0 }
  0x88   : >> { %3174 = vmatmul.mubr.msk.f32.vlgmr.msra.gmra.mrb[16].mxu0 %vm236_vm2, %v2667_v61  ;;  %v2735_v61 = vld [vmem:[%s4431_s1 + $0x498] sm:$0xff] }
  0x89   : >> { %3460 = vmatpush3.bf16.msra.mxu0 %v3459_v62  ;;  %3189 = vmatmul.mubr.msk.f32.vlgmr.msra.gmra.mrb[16].mxu1 %vm236_vm2, %v2675_v63  ;;  %v3516_v62 = vpack.c.bf16 %v2735_v61, %v2734_v60  ;;  %v2736_v63 = vld [vmem:[%s4431_s1 + $0x4a0] sm:$0xff] }
  0x8a   : >> { %3469 = vmatpush3.bf16.msra.mxu1 %v3468_v0  ;;  %3461 = vmatprep.subr.bf16.mxu0 %v3646_v4  ;;  %v2737_v0 = vld [vmem:[%s4431_s1 + $0x4a8] sm:$0xff] }
  0x8b   : >> { %3470 = vmatprep.subr.bf16.mxu1 %v3646_v4  ;;  %3203 = vmatprep.mubr.msk.f32.mxu0 %vm3647_vm1, %v3648_v12  ;;  %v3519_v1 = vpack.c.bf16 %v2737_v0, %v2736_v63 }
  0x8c   : >> { %3218 = vmatprep.mubr.msk.f32.mxu1 %vm3647_vm1, %v3648_v12 }
  0x8d   : >> { %3463 = vmatpush3.bf16.msra.mxu0 %v3462_v6 }
  0x8e   : >> { %3472 = vmatpush3.bf16.msra.mxu1 %v3471_v7  ;;  %3464 = vmatprep.subr.bf16.mxu0 %v3646_v4 }
  0x8f   : >> { %3473 = vmatprep.subr.bf16.mxu1 %v3646_v4 }
  0x91   : >> { %3466 = vmatpush3.bf16.msra.mxu0 %v3465_v13 }
  0x92   : >> { %3475 = vmatpush3.bf16.msra.mxu1 %v3474_v14  ;;  %3476 = vmatprep.subr.bf16.mxu0 %v3646_v4 }
  0x93   : >> { %3485 = vmatprep.subr.bf16.mxu1 %v3646_v4 }
  0x94   : >> { %3204 = vmatmul.mubr.msk.f32.vlgmr.msra.gmra.mrb[18].mxu0 %vm236_vm2, %v2683_v19 }
  0x95   : >> { %3478 = vmatpush3.bf16.msra.mxu0 %v3477_v20  ;;  %3219 = vmatmul.mubr.msk.f32.vlgmr.msra.gmra.mrb[18].mxu1 %vm236_vm2, %v2691_v21 }
  0x96   : >> { %3487 = vmatpush3.bf16.msra.mxu1 %v3486_v22  ;;  %3479 = vmatprep.subr.bf16.mxu0 %v3646_v4 }
  0x97   : >> { %3488 = vmatprep.subr.bf16.mxu1 %v3646_v4  ;;  %3233 = vmatprep.mubr.msk.f32.mxu0 %vm3647_vm1, %v3648_v12 }
  0x98   : >> { %3248 = vmatprep.mubr.msk.f32.mxu1 %vm3647_vm1, %v3648_v12 }
  0x99   : >> { %3481 = vmatpush3.bf16.msra.mxu0 %v3480_v27 }
  0x9a   : >> { %3490 = vmatpush3.bf16.msra.mxu1 %v3489_v28  ;;  %3482 = vmatprep.subr.bf16.mxu0 %v3646_v4 }
  0x9b   : >> { %3491 = vmatprep.subr.bf16.mxu1 %v3646_v4 }
  0x9d   : >> { %3484 = vmatpush3.bf16.msra.mxu0 %v3483_v33 }
  0x9e   : >> { %3493 = vmatpush3.bf16.msra.mxu1 %v3492_v34  ;;  %3494 = vmatprep.subr.bf16.mxu0 %v3646_v4 }
  0x9f   : >> { %3503 = vmatprep.subr.bf16.mxu1 %v3646_v4 }
  0xa0   : >> { %3234 = vmatmul.mubr.msk.f32.vlgmr.msra.gmra.mrb[20].mxu0 %vm236_vm2, %v2699_v39 }
  0xa1   : >> { %3496 = vmatpush3.bf16.msra.mxu0 %v3495_v40  ;;  %3249 = vmatmul.mubr.msk.f32.vlgmr.msra.gmra.mrb[20].mxu1 %vm236_vm2, %v2707_v41 }
  0xa2   : >> { %3505 = vmatpush3.bf16.msra.mxu1 %v3504_v42  ;;  %3497 = vmatprep.subr.bf16.mxu0 %v3646_v4 }
  0xa3   : >> { %3506 = vmatprep.subr.bf16.mxu1 %v3646_v4  ;;  %3263 = vmatprep.mubr.msk.f32.mxu0 %vm3647_vm1, %v3648_v12 }
  0xa4   : >> { %3278 = vmatprep.mubr.msk.f32.mxu1 %vm3647_vm1, %v3648_v12 }
  0xa5   : >> { %3499 = vmatpush3.bf16.msra.mxu0 %v3498_v47 }
  0xa6   : >> { %3508 = vmatpush3.bf16.msra.mxu1 %v3507_v48  ;;  %3500 = vmatprep.subr.bf16.mxu0 %v3646_v4 }
  0xa7   : >> { %3509 = vmatprep.subr.bf16.mxu1 %v3646_v4 }
  0xa9   : >> { %3502 = vmatpush3.bf16.msra.mxu0 %v3501_v53 }
  0xaa   : >> { %3511 = vmatpush3.bf16.msra.mxu1 %v3510_v54  ;;  %3512 = vmatprep.subr.bf16.mxu0 %v3646_v4 }
  0xac   : >> { %3264 = vmatmul.mubr.msk.f32.vlgmr.msra.gmra.mrb[22].mxu0 %vm236_vm2, %v2715_v57 }
  0xad   : >> { %3514 = vmatpush3.bf16.msra.mxu0 %v3513_v58  ;;  %3279 = vmatmul.mubr.msk.f32.vlgmr.msra.gmra.mrb[22].mxu1 %vm236_vm2, %v2723_v59 }
  0xae   : >> { %3515 = vmatprep.subr.bf16.mxu0 %v3646_v4  ;;  %3293 = vmatprep.mubr.msk.f32.mxu0 %vm3647_vm1, %v3648_v12 }
  0xb1   : >> { %3517 = vmatpush3.bf16.msra.mxu0 %v3516_v62 }
  0xb2   : >> { %3518 = vmatprep.subr.bf16.mxu0 %v3646_v4 }
  0xb5   : >> { %3520 = vmatpush3.bf16.msra.mxu0 %v3519_v1 }
  0xb8   : >> { %3294 = vmatmul.mubr.msk.f32.vlgmr.msra.gmra.mrb[24].mxu0 %vm236_vm2, %v2731_v2 }
  0xfb   : >> { %v306_v3 = vpop.f32.mrb[0].mxu0 }
  0xfc   : >> { %v2935_v5 = vpop.f32.mrb[1].mxu0  ;;  %v379_v6 = vpop.f32.mrb[0].mxu1 }
  0xfd   : >> { %v380_v7 = vadd.f32 %v379_v6, %v306_v3  ;;  %v2950_v8 = vpop.f32.mrb[1].mxu1 }
 0x107   : >> { %v462_v9 = vpop.f32.mrb[2].mxu0 }
 0x108   : >> { %v466_v10 = vadd.f32 %v462_v9, %v380_v7  ;;  %v2965_v11 = vpop.f32.mrb[3].mxu0  ;;  %v546_v13 = vpop.f32.mrb[2].mxu1 }
 0x109   : >> { %v2980_v14 = vpop.f32.mrb[3].mxu1 }
 0x10a   : >> { %v550_v15 = vadd.f32 %v546_v13, %v466_v10  ;;  %v2739_v13 = vld [vmem:[%s4432_s2] ss:$0 sm:$0xff] }
 0x113   : >> { %v630_v12 = vpop.f32.mrb[4].mxu0 }
 0x114   : >> { %v634_v16 = vadd.f32 %v630_v12, %v550_v15  ;;  %v2995_v17 = vpop.f32.mrb[5].mxu0  ;;  %v715_v18 = vpop.f32.mrb[4].mxu1 }
 0x115   : >> { %v3010_v4 = vpop.f32.mrb[5].mxu1 }
 0x116   : >> { %v719_v19 = vadd.f32 %v715_v18, %v634_v16 }
 0x11f   : >> { %v799_v20 = vpop.f32.mrb[6].mxu0 }
 0x120   : >> { %v803_v21 = vadd.f32 %v799_v20, %v719_v19  ;;  %v3025_v22 = vpop.f32.mrb[7].mxu0  ;;  %v883_v23 = vpop.f32.mrb[6].mxu1 }
 0x121   : >> { %v3040_v24 = vpop.f32.mrb[7].mxu1 }
 0x122   : >> { %v887_v25 = vadd.f32 %v883_v23, %v803_v21 }
 0x12b   : >> { %v967_v26 = vpop.f32.mrb[8].mxu0 }
 0x12c   : >> { %v971_v27 = vadd.f32 %v967_v26, %v887_v25  ;;  %v3055_v28 = vpop.f32.mrb[9].mxu0  ;;  %v1051_v29 = vpop.f32.mrb[8].mxu1 }
 0x12d   : >> { %v3070_v30 = vpop.f32.mrb[9].mxu1 }
 0x12e   : >> { %v1055_v31 = vadd.f32 %v1051_v29, %v971_v27  ;;  %v2346_v30 = vld [vmem:[%s3728_s30] sm:$0x3] }
 0x137   : >> { %v1136_v32 = vpop.f32.mrb[10].mxu0 }
 0x138   : >> { %v1140_v33 = vadd.f32 %v1136_v32, %v1055_v31  ;;  %v3085_v34 = vpop.f32.mrb[11].mxu0  ;;  %v1220_v35 = vpop.f32.mrb[10].mxu1 }
 0x139   : >> { %v3100_v36 = vpop.f32.mrb[11].mxu1 }
 0x13a   : >> { %v1224_v37 = vadd.f32 %v1220_v35, %v1140_v33 }
 0x143   : >> { %v1304_v38 = vpop.f32.mrb[12].mxu0 }
 0x144   : >> { %v1308_v39 = vadd.f32 %v1304_v38, %v1224_v37  ;;  %v3115_v40 = vpop.f32.mrb[13].mxu0  ;;  %v1388_v41 = vpop.f32.mrb[12].mxu1 }
 0x145   : >> { %v3130_v42 = vpop.f32.mrb[13].mxu1 }
 0x146   : >> { %v1392_v43 = vadd.f32 %v1388_v41, %v1308_v39 }
 0x14f   : >> { %v1472_v44 = vpop.f32.mrb[14].mxu0 }
 0x150   : >> { %v1476_v45 = vadd.f32 %v1472_v44, %v1392_v43  ;;  %v3145_v46 = vpop.f32.mrb[15].mxu0  ;;  %v1557_v47 = vpop.f32.mrb[14].mxu1 }
 0x151   : >> { %v3160_v48 = vpop.f32.mrb[15].mxu1 }
 0x152   : >> { %v1561_v49 = vadd.f32 %v1557_v47, %v1476_v45 }
 0x15b   : >> { %v1641_v50 = vpop.f32.mrb[16].mxu0 }
 0x15c   : >> { %v1645_v51 = vadd.f32 %v1641_v50, %v1561_v49  ;;  %v3175_v52 = vpop.f32.mrb[17].mxu0  ;;  %v1725_v53 = vpop.f32.mrb[16].mxu1 }
 0x15d   : >> { %v3190_v54 = vpop.f32.mrb[17].mxu1 }
 0x15e   : >> { %v1729_v55 = vadd.f32 %v1725_v53, %v1645_v51 }
 0x167   : >> { %v1809_v56 = vpop.f32.mrb[18].mxu0 }
 0x168   : >> { %v1813_v57 = vadd.f32 %v1809_v56, %v1729_v55  ;;  %v3205_v58 = vpop.f32.mrb[19].mxu0  ;;  %v1893_v59 = vpop.f32.mrb[18].mxu1 }
 0x169   : >> { %v3220_v60 = vpop.f32.mrb[19].mxu1 }
 0x16a   : >> { %v1897_v61 = vadd.f32 %v1893_v59, %v1813_v57 }
 0x173   : >> { %v1978_v62 = vpop.f32.mrb[20].mxu0 }
 0x174   : >> { %v1982_v63 = vadd.f32 %v1978_v62, %v1897_v61  ;;  %v3235_v0 = vpop.f32.mrb[21].mxu0  ;;  %v2062_v1 = vpop.f32.mrb[20].mxu1 }
 0x175   : >> { %v3250_v2 = vpop.f32.mrb[21].mxu1 }
 0x176   : >> { %v2066_v3 = vadd.f32 %v2062_v1, %v1982_v63 }
 0x17f   : >> { %v2146_v5 = vpop.f32.mrb[22].mxu0 }
 0x180   : >> { %v2150_v6 = vadd.f32 %v2146_v5, %v2066_v3  ;;  %v3265_v7 = vpop.f32.mrb[23].mxu0  ;;  %v2230_v8 = vpop.f32.mrb[22].mxu1 }
 0x181   : >> { %v3280_v9 = vpop.f32.mrb[23].mxu1 }
 0x182   : >> { %v2234_v10 = vadd.f32 %v2230_v8, %v2150_v6 }
 0x18b   : >> { %v2314_v11 = vpop.f32.mrb[24].mxu0 }
 0x18c   : >> { %v2318_v14 = vadd.f32 %v2314_v11, %v2234_v10  ;;  %v3295_v15 = vpop.f32.mrb[25].mxu0 }
 0x18e   : >> { %v2326_v12 = vadd.f32 %v2739_v13, %v2318_v14 }
 0x190   : >> { %2330 = vst.msk [vmem:[%s2328_s29] sm:$0xff] %vm2329_vm3, %v2326_v12  ;;  %v2331_v16 = vsel %vm2329_vm3, %v2326_v12, 0.0  ;;  %v2338_v17 = vmul.f32 %v2326_v12, %v2326_v12 }
 0x191   : >> { %v2332_v18 = vrot.slane %v2331_v16, 4 }
 0x192   : >> { %v2339_v4 = vsel %vm2329_vm3, %v2338_v17, 0.0 }
 0x193   : >> { %v2333_v19 = vadd.f32 %v2332_v18, %v2331_v16  ;;  %v2340_v20 = vrot.slane %v2339_v4, 4 }
 0x195   : >> { %v2334_v21 = vrot.slane %v2333_v19, 2  ;;  %v2341_v22 = vadd.f32 %v2340_v20, %v2339_v4 }
 0x197   : >> { %v2335_v23 = vadd.f32 %v2334_v21, %v2333_v19  ;;  %v2342_v24 = vrot.slane %v2341_v22, 2 }
 0x199   : >> { %v2336_v25 = vrot.slane %v2335_v23, 1  ;;  %v2343_v26 = vadd.f32 %v2342_v24, %v2341_v22 }
 0x19b   : >> { %v2344_v27 = vrot.slane %v2343_v26, 1  ;;  %v2337_v28 = vadd.f32 %v2336_v25, %v2335_v23 }
 0x19c   : > { %215 = sbr.rel (!%p213_p11) target bundleno = 26 (0x1a), region = 136 }
 0x19d   : >> { %v2345_v29 = vadd.f32 %v2344_v27, %v2343_v26 }
 0x19f   : >> { %v2348_v31 = vsel %vm2347_vm4, %v2337_v28, %v2345_v29 }
 0x1a0   : >> { %v2349_v32 = vadd.f32 %v2348_v31, %v2346_v30 }
 0x1a2   : >> { %2350 = vst.msk [vmem:[%s3728_s30] sm:$0x3] %vm209_vm0, %v2349_v32 }
 0x1a3   : > { %3586 = shalt.err (!%p3583_p4)
}
 0x1a4   : > { %s3587_s19 = scalar_lea.hbm %s4391_s10, 32  ;;  %s3591_s22 = scalar_lea.hbm %s4434_s4, 64 }
 0x1a5   : > { %p3588_p7 = scmp.ne.s32.totalorder %s4391_s10, %s3587_s19  ;;  %p3592_p10 = scmp.lt.u32.totalorder %s4391_s10, %s4434_s4 }
 0x1a6   : > { %p3593_p11 = scmp.lt.u32.totalorder %s3591_s22, %s3587_s19  ;;  %p3595_p13 = scmp.lt.u32.totalorder %s3587_s19, %s4391_s10 }
 0x1a7   : > { %p3589_p8 = pnand %p3588_p7, %p3713_p5 }
 0x1a8   : > { %p3594_p12 = por %p3593_p11, %p3592_p10 }
 0x1a9   : > { %p3590_p9 = pneg %p3589_p8 }
 0x1aa   : > { %p3596_p0 = por %p3595_p13, %p3594_p12 }
 0x1ac   : > { %p3597_p1 = pnand %p3596_p0, %p3590_p9 }
 0x1ae   : > { %3600 = shalt.err (!%p3597_p1)
}
 0x1af   : > { %3522 = dma.vmem_to_hbm [thread:$0]  (%p3713_p5), %s2374_s7, 32, %s4391_s10, %s2357_s11  }
 0x1b0 PF: > { %p3528_p2 = scmp.ge.s32.totalorder %s3639_s18, 2  ;;  %s2393_s28 = sand.u32 1, %s3627_s15  }
 0x1b1   : > { %s2394_s29 = scalar_lea.sflag [#allocation3], %s2393_s28 }
 0x1b2   : > { %p3525_p3 = pnand %p3528_p2, %p3717_p6 }
 0x1b4   : > { %3622 = dma.done.wait (!%p3525_p3), %s2394_s29, 32  }
 0x1b5   : > { %3624 = vsyncadd (!%p3525_p3), %s2394_s29, 4294967264  ;;  %p15_p4 = scmp.ge.s32.totalorder %s3700_s21, 4   ;;  %s4437_s15 = smov %s3631_s16 }
 0x1b6   : > { %s4438_s16 = smov %s3635_s17  ;;  %s4439_s17 = smov %s3711_s24 }
 0x1b7   : > { %s4440_s18 = smov %s3700_s21  ;;  %17 = sbr.rel (!%p15_p4) target bundleno = 3 (0x3), region = 147 }
 0x1be   :  { %2399 = vsyncpa [#allocation3], 1 }
 0x1bf   :  { %2401 = vsyncpa [#allocation3 + $0x1], 1 }

</bundles_post_ra>
